<compile_context>
chip_gen: v6e
topology: v6e:2x2x1
jax: 0.10.0
libtpu: 0.0.40
codegen_flags: <defaults>
</compile_context>

<pallas_src>
import jax
import jax.numpy as jnp
from jax import lax
from jax.experimental import pallas as pl
from jax.experimental.pallas import tpu as pltpu
import numpy as np

C1 = 64
C2 = 128
EPS = 1e-5


def _round_up(a, b):
    return (a + b - 1) // b * b


def cnn2_kernel(x_ref, w1_ref, b1_ref, w2_ref, b2_ref, wfc_ref, bfc_ref, out_ref):
    # x_ref: (D, TB) f32  -- time-major, batch on lanes.
    x = x_ref[...]
    D, TB = x.shape
    w1 = w1_ref[...]                         # (3, C1) f32, BN-folded
    c1 = w1.shape[1]

    # ---- Conv1d(1 -> 64, k=3, pad=1). Shift the small (D, TB) input along the
    #      leading time axis (cheap leading-axis concats), then broadcast-multiply
    #      each tap into the channel lanes:  out[t] = w0*x[t-1] + w1*x[t] + w2*x[t+1].
    zrow = jnp.zeros((1, TB), jnp.float32)
    x_prev = jnp.concatenate([zrow, x[:D - 1]], axis=0)    # x[t-1]
    x_next = jnp.concatenate([x[1:], zrow], axis=0)        # x[t+1]
    h1 = (x_prev[:, :, None] * w1[0]
          + x[:, :, None] * w1[1]
          + x_next[:, :, None] * w1[2])
    h1 = jnp.maximum(h1 + b1_ref[...], 0.0)                # BN folded; ReLU. (D, TB, C1)

    # ---- Conv1d(64 -> 128, k=3, pad=1): 3 MXU matmuls (M = D*TB collapsed),
    #      bf16 in / f32 accumulate.
    h1b = h1.astype(jnp.bfloat16)
    zc = jnp.zeros((1, TB, c1), jnp.bfloat16)
    h1pad = jnp.concatenate([zc, h1b, zc], axis=0)         # (D+2, TB, C1), leading axis
    w2 = w2_ref[...]                                       # (3, C1, C2) bf16, BN-folded
    h2 = (jnp.einsum('tbc,cd->tbd', h1pad[0:D], w2[0],
                     preferred_element_type=jnp.float32)
          + jnp.einsum('tbc,cd->tbd', h1pad[1:D + 1], w2[1],
                       preferred_element_type=jnp.float32)
          + jnp.einsum('tbc,cd->tbd', h1pad[2:D + 2], w2[2],
                       preferred_element_type=jnp.float32))
    h2 = jnp.maximum(h2 + b2_ref[...], 0.0)                # (D, TB, C2) f32

    # ---- Flatten + Linear, expressed as a t-batched matmul + reduction over t
    #      (no (TB, D*C2) flatten relayout). wfc_ref: (D, C2, NPAD) bf16, zero-padded.
    part = jnp.einsum('tbc,tcn->tbn', h2.astype(jnp.bfloat16), wfc_ref[...],
                      preferred_element_type=jnp.float32)  # (D, TB, NPAD)
    out_ref[...] = jnp.sum(part, axis=0) + bfc_ref[...]    # (TB, NPAD) lane-dense


def cnn2_forward(x, kp, num_classes):
    """x: (B, D) float32. kp: kernel-layout (time-/channel-last) folded params."""
    B, D = x.shape
    NPAD = kp['wfc'].shape[-1]

    # Batch tile: 256 lanes when it divides B exactly (amortizes per-step overhead),
    # else 128 for large B, else a single full (8-aligned) tile.
    if B >= 256 and B % 256 == 0:
        TB = 256
    elif B >= 128:
        TB = 128
    else:
        TB = _round_up(B, 8)
    BPAD = _round_up(B, TB)

    xT = jnp.transpose(x)                                  # (D, B): time on sublanes
    if BPAD != B:
        xT = jnp.pad(xT, ((0, 0), (0, BPAD - B)))          # zero-pad batch

    flops = 2 * BPAD * D * (3 * C1 + 3 * C1 * C2 + C2 * NPAD)
    bytes_accessed = (BPAD * D * 4 + BPAD * NPAD * 4
                      + 3 * C1 * 4 + C1 * 4
                      + 3 * C1 * C2 * 2 + C2 * 4
                      + D * C2 * NPAD * 2 + NPAD * 4)

    out = pl.pallas_call(
        cnn2_kernel,
        out_shape=jax.ShapeDtypeStruct((BPAD, NPAD), jnp.float32),
        grid=(BPAD // TB,),
        in_specs=[
            pl.BlockSpec((D, TB), lambda i: (0, i)),               # x tile (pipelined)
            pl.BlockSpec((3, C1), lambda i: (0, 0)),               # w1 (resident)
            pl.BlockSpec((1, C1), lambda i: (0, 0)),               # b1
            pl.BlockSpec((3, C1, C2), lambda i: (0, 0, 0)),        # w2
            pl.BlockSpec((1, C2), lambda i: (0, 0)),               # b2
            pl.BlockSpec((D, C2, NPAD), lambda i: (0, 0, 0)),      # wfc
            pl.BlockSpec((1, NPAD), lambda i: (0, 0)),             # bfc
        ],
        out_specs=pl.BlockSpec((TB, NPAD), lambda i: (i, 0)),
        compiler_params=pltpu.CompilerParams(
            dimension_semantics=("parallel",),
            vmem_limit_bytes=48 * 1024 * 1024,
        ),
        cost_estimate=pl.CostEstimate(flops=int(flops), transcendentals=0,
                                      bytes_accessed=int(bytes_accessed)),
    )(xT, kp['w1'], kp['b1'], kp['w2'], kp['b2'], kp['wfc'], kp['bfc'])

    return out[:B, :num_classes]


def make_params(key, input_dim, num_classes):
    """Deterministic params in PyTorch layout, plus kernel-layout BN-folded copies."""
    ks = jax.random.split(key, 8)
    # PyTorch-layout parameters
    w1_pt = jax.random.normal(ks[0], (C1, 1, 3), jnp.float32) * 0.2     # Conv1d(1,64,3)
    b1_pt = jax.random.normal(ks[1], (C1,), jnp.float32) * 0.1
    w2_pt = jax.random.normal(ks[2], (C2, C1, 3), jnp.float32) * 0.05   # Conv1d(64,128,3)
    b2_pt = jax.random.normal(ks[3], (C2,), jnp.float32) * 0.1
    wfc_pt = jax.random.normal(ks[4], (num_classes, C2 * input_dim), jnp.float32) * 0.02
    bfc_pt = jax.random.normal(ks[5], (num_classes,), jnp.float32) * 0.1
    # BatchNorm (eval mode): fold running stats into per-channel scale/shift
    g1 = 1.0 + 0.1 * jax.random.normal(ks[6], (C1,), jnp.float32)
    be1 = 0.05 * jnp.arange(C1, dtype=jnp.float32) / C1
    g2 = 1.0 + 0.1 * jax.random.normal(ks[7], (C2,), jnp.float32)
    be2 = -0.05 * jnp.arange(C2, dtype=jnp.float32) / C2
    rm1 = jnp.zeros((C1,), jnp.float32); rv1 = jnp.ones((C1,), jnp.float32)
    rm2 = jnp.zeros((C2,), jnp.float32); rv2 = jnp.ones((C2,), jnp.float32)
    s1 = g1 / jnp.sqrt(rv1 + EPS); t1 = be1 - rm1 * s1
    s2 = g2 / jnp.sqrt(rv2 + EPS); t2 = be2 - rm2 * s2

    # ---- kernel layout: channels-last / time-major, BN folded into weights ----
    NPAD = _round_up(num_classes, 128)
    w1_k = jnp.transpose(w1_pt, (2, 1, 0)).reshape(3, C1) * s1[None, :]          # (3, C1)
    b1_k = (b1_pt * s1 + t1).reshape(1, C1)
    w2_k = (jnp.transpose(w2_pt, (2, 1, 0)) * s2[None, None, :]).astype(jnp.bfloat16)
    b2_k = (b2_pt * s2 + t2).reshape(1, C2)
    # PyTorch flatten order is (channel, time): wfc_pt[n, c*D + t] -> wfc_k[t, c, n]
    wfc_k = wfc_pt.reshape(num_classes, C2, input_dim).transpose(2, 1, 0)        # (D, C2, N)
    wfc_k = jnp.pad(wfc_k, ((0, 0), (0, 0), (0, NPAD - num_classes))).astype(jnp.bfloat16)
    bfc_k = jnp.pad(bfc_pt, (0, NPAD - num_classes)).reshape(1, NPAD)

    pt = dict(w1=w1_pt, b1=b1_pt, w2=w2_pt, b2=b2_pt, wfc=wfc_pt, bfc=bfc_pt,
              s1=s1, t1=t1, s2=s2, t2=t2)
    kp = dict(w1=w1_k, b1=b1_k, w2=w2_k, b2=b2_k, wfc=wfc_k, bfc=bfc_k)
    return pt, kp


def reference_forward(x, pt):
    """Pure-JAX f32 reference replicating PyTorch NCL semantics."""
    B, D = x.shape
    h = x.reshape(B, 1, D)
    h = lax.conv_general_dilated(h, pt['w1'], (1,), [(1, 1)],
                                 dimension_numbers=('NCH', 'OIH', 'NCH'))
    h = h + pt['b1'][None, :, None]
    h = h * pt['s1'][None, :, None] + pt['t1'][None, :, None]
    h = jnp.maximum(h, 0.0)
    h = lax.conv_general_dilated(h, pt['w2'], (1,), [(1, 1)],
                                 dimension_numbers=('NCH', 'OIH', 'NCH'))
    h = h + pt['b2'][None, :, None]
    h = h * pt['s2'][None, :, None] + pt['t2'][None, :, None]
    h = jnp.maximum(h, 0.0)                                  # (B, 128, D)
    flat = h.reshape(B, C2 * D)                              # channels-first flatten
    return flat @ pt['wfc'].T + pt['bfc']


if __name__ == "__main__":
    batch = 2
    input_dim = 16
    num_classes = 10

    key = jax.random.PRNGKey(0)
    kx, kparam = jax.random.split(key)
    x = jax.random.normal(kx, (batch, input_dim), jnp.float32)

    pt_params, kern_params = make_params(kparam, input_dim, num_classes)

    out = cnn2_forward(x, kern_params, num_classes)
    out = jax.block_until_ready(out)

    ref = reference_forward(x, pt_params)
    # bf16 MXU operands with f32 accumulation -> slightly looser tolerance than pure f32.
    np.testing.assert_allclose(np.asarray(out), np.asarray(ref), rtol=2e-2, atol=2e-2)

    print("KERNEL_OK")
</pallas_src>

<mosaic_0001>
module attributes {stable_mosaic.version = 11 : i64} {
  func.func @cnn2_kernel(%arg0: i32, %arg1: memref<16x8xf32, #tpu.memory_space<vmem>>, %arg2: memref<3x64xf32, #tpu.memory_space<vmem>>, %arg3: memref<1x64xf32, #tpu.memory_space<vmem>>, %arg4: memref<3x64x128xbf16, #tpu.memory_space<vmem>>, %arg5: memref<1x128xf32, #tpu.memory_space<vmem>>, %arg6: memref<16x128x128xbf16, #tpu.memory_space<vmem>>, %arg7: memref<1x128xf32, #tpu.memory_space<vmem>>, %arg8: memref<8x128xf32, #tpu.memory_space<vmem>>) attributes {dimension_semantics = [#tpu.dimension_semantics<parallel>], iteration_bounds = array<i64: 1>, scalar_prefetch = 0 : i64, scratch_operands = 0 : i64, tpu.core_type = #tpu.core_type<tc>, window_params = [{transform_indices = @transform_0, window_bounds = array<i64: 16, 8>}, {pipeline_mode = #tpu.pipeline_mode<synchronous>, transform_indices = @transform_1, window_bounds = array<i64: 3, 64>}, {pipeline_mode = #tpu.pipeline_mode<synchronous>, transform_indices = @transform_2, window_bounds = array<i64: 1, 64>}, {pipeline_mode = #tpu.pipeline_mode<synchronous>, transform_indices = @transform_3, window_bounds = array<i64: 3, 64, 128>}, {pipeline_mode = #tpu.pipeline_mode<synchronous>, transform_indices = @transform_4, window_bounds = array<i64: 1, 128>}, {pipeline_mode = #tpu.pipeline_mode<synchronous>, transform_indices = @transform_5, window_bounds = array<i64: 16, 128, 128>}, {pipeline_mode = #tpu.pipeline_mode<synchronous>, transform_indices = @transform_6, window_bounds = array<i64: 1, 128>}, {transform_indices = @transform_7, window_bounds = array<i64: 8, 128>}]} {
    %c0 = arith.constant 0 : index
    %c0_0 = arith.constant 0 : index
    %0 = vector.load %arg1[%c0, %c0_0] : memref<16x8xf32, #tpu.memory_space<vmem>>, vector<16x8xf32>
    %c0_1 = arith.constant 0 : index
    %c0_2 = arith.constant 0 : index
    %1 = vector.load %arg2[%c0_1, %c0_2] : memref<3x64xf32, #tpu.memory_space<vmem>>, vector<3x64xf32>
    %cst = arith.constant 0.000000e+00 : f32
    %2 = vector.broadcast %cst : f32 to vector<1x8xf32>
    %3 = vector.extract_strided_slice %0 {offsets = [0, 0], sizes = [15, 8], strides = [1, 1]} : vector<16x8xf32> to vector<15x8xf32>
    %4 = tpu.concatenate %2, %3 in 0 : vector<1x8xf32>, vector<15x8xf32> -> vector<16x8xf32>
    %5 = vector.extract_strided_slice %0 {offsets = [1, 0], sizes = [15, 8], strides = [1, 1]} : vector<16x8xf32> to vector<15x8xf32>
    %6 = tpu.concatenate %5, %2 in 0 : vector<15x8xf32>, vector<1x8xf32> -> vector<16x8xf32>
    %7 = vector.shape_cast %4 : vector<16x8xf32> to vector<16x8x1xf32>
    %8 = vector.extract_strided_slice %1 {offsets = [0, 0], sizes = [1, 64], strides = [1, 1]} : vector<3x64xf32> to vector<1x64xf32>
    %9 = vector.shape_cast %8 : vector<1x64xf32> to vector<64xf32>
    %10 = vector.shape_cast %9 : vector<64xf32> to vector<1x1x64xf32>
    %11 = vector.broadcast %7 : vector<16x8x1xf32> to vector<16x8x64xf32>
    %12 = vector.broadcast %10 : vector<1x1x64xf32> to vector<16x8x64xf32>
    %13 = arith.mulf %11, %12 : vector<16x8x64xf32>
    %14 = vector.shape_cast %0 : vector<16x8xf32> to vector<16x8x1xf32>
    %15 = vector.extract_strided_slice %1 {offsets = [1, 0], sizes = [1, 64], strides = [1, 1]} : vector<3x64xf32> to vector<1x64xf32>
    %16 = vector.shape_cast %15 : vector<1x64xf32> to vector<64xf32>
    %17 = vector.shape_cast %16 : vector<64xf32> to vector<1x1x64xf32>
    %18 = vector.broadcast %14 : vector<16x8x1xf32> to vector<16x8x64xf32>
    %19 = vector.broadcast %17 : vector<1x1x64xf32> to vector<16x8x64xf32>
    %20 = arith.mulf %18, %19 : vector<16x8x64xf32>
    %21 = arith.addf %13, %20 : vector<16x8x64xf32>
    %22 = vector.shape_cast %6 : vector<16x8xf32> to vector<16x8x1xf32>
    %23 = vector.extract_strided_slice %1 {offsets = [2, 0], sizes = [1, 64], strides = [1, 1]} : vector<3x64xf32> to vector<1x64xf32>
    %24 = vector.shape_cast %23 : vector<1x64xf32> to vector<64xf32>
    %25 = vector.shape_cast %24 : vector<64xf32> to vector<1x1x64xf32>
    %26 = vector.broadcast %22 : vector<16x8x1xf32> to vector<16x8x64xf32>
    %27 = vector.broadcast %25 : vector<1x1x64xf32> to vector<16x8x64xf32>
    %28 = arith.mulf %26, %27 : vector<16x8x64xf32>
    %29 = arith.addf %21, %28 : vector<16x8x64xf32>
    %c0_3 = arith.constant 0 : index
    %c0_4 = arith.constant 0 : index
    %30 = vector.load %arg3[%c0_3, %c0_4] : memref<1x64xf32, #tpu.memory_space<vmem>>, vector<1x64xf32>
    %31 = vector.shape_cast %30 : vector<1x64xf32> to vector<1x1x64xf32>
    %32 = vector.broadcast %31 : vector<1x1x64xf32> to vector<16x8x64xf32>
    %33 = arith.addf %29, %32 : vector<16x8x64xf32>
    %cst_5 = arith.constant 0.000000e+00 : f32
    %34 = vector.broadcast %cst_5 : f32 to vector<16x8x64xf32>
    %35 = arith.maximumf %33, %34 : vector<16x8x64xf32>
    %36 = arith.truncf %35 : vector<16x8x64xf32> to vector<16x8x64xbf16>
    %cst_6 = arith.constant 0.000000e+00 : bf16
    %37 = vector.broadcast %cst_6 : bf16 to vector<1x8x64xbf16>
    %38 = tpu.concatenate %37, %36, %37 in 0 : vector<1x8x64xbf16>, vector<16x8x64xbf16>, vector<1x8x64xbf16> -> vector<18x8x64xbf16>
    %c0_7 = arith.constant 0 : index
    %c0_8 = arith.constant 0 : index
    %c0_9 = arith.constant 0 : index
    %39 = vector.load %arg4[%c0_7, %c0_8, %c0_9] : memref<3x64x128xbf16, #tpu.memory_space<vmem>>, vector<3x64x128xbf16>
    %40 = vector.extract_strided_slice %38 {offsets = [0, 0, 0], sizes = [16, 8, 64], strides = [1, 1, 1]} : vector<18x8x64xbf16> to vector<16x8x64xbf16>
    %41 = vector.extract_strided_slice %39 {offsets = [0, 0, 0], sizes = [1, 64, 128], strides = [1, 1, 1]} : vector<3x64x128xbf16> to vector<1x64x128xbf16>
    %42 = vector.shape_cast %41 : vector<1x64x128xbf16> to vector<64x128xbf16>
    "tpu.trace_start"() <{level = 10 : i32, message = "tbc,cd->tbd"}> : () -> ()
    %cst_10 = arith.constant dense<0.000000e+00> : vector<16x8x128xf32>
    %43 = tpu.matmul %40, %42, %cst_10 {dimension_numbers = #tpu.dot_dimension_numbers<[2], [0], [0, 1], [1], [0, 0, 0, 1, 1, 1], [], []>} : vector<16x8x64xbf16>, vector<64x128xbf16>, vector<16x8x128xf32> -> vector<16x8x128xf32>
    "tpu.trace_stop"() : () -> ()
    %44 = vector.extract_strided_slice %38 {offsets = [1, 0, 0], sizes = [16, 8, 64], strides = [1, 1, 1]} : vector<18x8x64xbf16> to vector<16x8x64xbf16>
    %45 = vector.extract_strided_slice %39 {offsets = [1, 0, 0], sizes = [1, 64, 128], strides = [1, 1, 1]} : vector<3x64x128xbf16> to vector<1x64x128xbf16>
    %46 = vector.shape_cast %45 : vector<1x64x128xbf16> to vector<64x128xbf16>
    "tpu.trace_start"() <{level = 10 : i32, message = "tbc,cd->tbd"}> : () -> ()
    %cst_11 = arith.constant dense<0.000000e+00> : vector<16x8x128xf32>
    %47 = tpu.matmul %44, %46, %cst_11 {dimension_numbers = #tpu.dot_dimension_numbers<[2], [0], [0, 1], [1], [0, 0, 0, 1, 1, 1], [], []>} : vector<16x8x64xbf16>, vector<64x128xbf16>, vector<16x8x128xf32> -> vector<16x8x128xf32>
    "tpu.trace_stop"() : () -> ()
    %48 = arith.addf %43, %47 : vector<16x8x128xf32>
    %49 = vector.extract_strided_slice %38 {offsets = [2, 0, 0], sizes = [16, 8, 64], strides = [1, 1, 1]} : vector<18x8x64xbf16> to vector<16x8x64xbf16>
    %50 = vector.extract_strided_slice %39 {offsets = [2, 0, 0], sizes = [1, 64, 128], strides = [1, 1, 1]} : vector<3x64x128xbf16> to vector<1x64x128xbf16>
    %51 = vector.shape_cast %50 : vector<1x64x128xbf16> to vector<64x128xbf16>
    "tpu.trace_start"() <{level = 10 : i32, message = "tbc,cd->tbd"}> : () -> ()
    %cst_12 = arith.constant dense<0.000000e+00> : vector<16x8x128xf32>
    %52 = tpu.matmul %49, %51, %cst_12 {dimension_numbers = #tpu.dot_dimension_numbers<[2], [0], [0, 1], [1], [0, 0, 0, 1, 1, 1], [], []>} : vector<16x8x64xbf16>, vector<64x128xbf16>, vector<16x8x128xf32> -> vector<16x8x128xf32>
    "tpu.trace_stop"() : () -> ()
    %53 = arith.addf %48, %52 : vector<16x8x128xf32>
    %c0_13 = arith.constant 0 : index
    %c0_14 = arith.constant 0 : index
    %54 = vector.load %arg5[%c0_13, %c0_14] : memref<1x128xf32, #tpu.memory_space<vmem>>, vector<1x128xf32>
    %55 = vector.shape_cast %54 : vector<1x128xf32> to vector<1x1x128xf32>
    %56 = vector.broadcast %55 : vector<1x1x128xf32> to vector<16x8x128xf32>
    %57 = arith.addf %53, %56 : vector<16x8x128xf32>
    %cst_15 = arith.constant 0.000000e+00 : f32
    %58 = vector.broadcast %cst_15 : f32 to vector<16x8x128xf32>
    %59 = arith.maximumf %57, %58 : vector<16x8x128xf32>
    %60 = arith.truncf %59 : vector<16x8x128xf32> to vector<16x8x128xbf16>
    %c0_16 = arith.constant 0 : index
    %c0_17 = arith.constant 0 : index
    %c0_18 = arith.constant 0 : index
    %61 = vector.load %arg6[%c0_16, %c0_17, %c0_18] : memref<16x128x128xbf16, #tpu.memory_space<vmem>>, vector<16x128x128xbf16>
    "tpu.trace_start"() <{level = 10 : i32, message = "tbc,tcn->tbn"}> : () -> ()
    %cst_19 = arith.constant dense<0.000000e+00> : vector<16x8x128xf32>
    %62 = tpu.matmul %60, %61, %cst_19 {dimension_numbers = #tpu.dot_dimension_numbers<[2], [1], [1], [2], [0, 0, 0, 1, 1, 2], [0], [0]>} : vector<16x8x128xbf16>, vector<16x128x128xbf16>, vector<16x8x128xf32> -> vector<16x8x128xf32>
    "tpu.trace_stop"() : () -> ()
    %cst_20 = arith.constant dense<0.000000e+00> : vector<8x128xf32>
    %63 = vector.multi_reduction <add>, %62, %cst_20 [0] : vector<16x8x128xf32> to vector<8x128xf32>
    %c0_21 = arith.constant 0 : index
    %c0_22 = arith.constant 0 : index
    %64 = vector.load %arg7[%c0_21, %c0_22] : memref<1x128xf32, #tpu.memory_space<vmem>>, vector<1x128xf32>
    %65 = vector.broadcast %64 : vector<1x128xf32> to vector<8x128xf32>
    %66 = arith.addf %63, %65 : vector<8x128xf32>
    %c0_23 = arith.constant 0 : index
    %c0_24 = arith.constant 0 : index
    %67 = vector.load %arg8[%c0_23, %c0_24] : memref<8x128xf32, #tpu.memory_space<vmem>>, vector<8x128xf32>
    tpu.vector_store %arg8[%c0_23, %c0_24], %66 {strides = array<i32>} : memref<8x128xf32, #tpu.memory_space<vmem>>, vector<8x128xf32>,
    return
  }
  func.func @transform_0(%arg0: i32) -> (i32, i32) {
    %c0_i32 = arith.constant 0 : i32
    %c0_i32_0 = arith.constant 0 : i32
    return %c0_i32, %arg0 : i32, i32
  }
  func.func @transform_1(%arg0: i32) -> (i32, i32) {
    %c0_i32 = arith.constant 0 : i32
    %c0_i32_0 = arith.constant 0 : i32
    %c0_i32_1 = arith.constant 0 : i32
    return %c0_i32, %c0_i32_0 : i32, i32
  }
  func.func @transform_2(%arg0: i32) -> (i32, i32) {
    %c0_i32 = arith.constant 0 : i32
    %c0_i32_0 = arith.constant 0 : i32
    %c0_i32_1 = arith.constant 0 : i32
    return %c0_i32, %c0_i32_0 : i32, i32
  }
  func.func @transform_3(%arg0: i32) -> (i32, i32, i32) {
    %c0_i32 = arith.constant 0 : i32
    %c0_i32_0 = arith.constant 0 : i32
    %c0_i32_1 = arith.constant 0 : i32
    %c0_i32_2 = arith.constant 0 : i32
    return %c0_i32, %c0_i32_0, %c0_i32_1 : i32, i32, i32
  }
  func.func @transform_4(%arg0: i32) -> (i32, i32) {
    %c0_i32 = arith.constant 0 : i32
    %c0_i32_0 = arith.constant 0 : i32
    %c0_i32_1 = arith.constant 0 : i32
    return %c0_i32, %c0_i32_0 : i32, i32
  }
  func.func @transform_5(%arg0: i32) -> (i32, i32, i32) {
    %c0_i32 = arith.constant 0 : i32
    %c0_i32_0 = arith.constant 0 : i32
    %c0_i32_1 = arith.constant 0 : i32
    %c0_i32_2 = arith.constant 0 : i32
    return %c0_i32, %c0_i32_0, %c0_i32_1 : i32, i32, i32
  }
  func.func @transform_6(%arg0: i32) -> (i32, i32) {
    %c0_i32 = arith.constant 0 : i32
    %c0_i32_0 = arith.constant 0 : i32
    %c0_i32_1 = arith.constant 0 : i32
    return %c0_i32, %c0_i32_0 : i32, i32
  }
  func.func @transform_7(%arg0: i32) -> (i32, i32) {
    %c0_i32 = arith.constant 0 : i32
    %c0_i32_0 = arith.constant 0 : i32
    return %arg0, %c0_i32 : i32, i32
  }
}

</mosaic_0001>

<bundles_post_ra>
// kernel: tpu_custom_call.1
= control target key start
LH: loop header
LB: loop body
LE: loop exit
PB: predicated region body
PF: predicated region fallthrough
CT: control target
= control target key end

     0   :  { %12 = vsyncpa [#allocation3], 0  ;;  %s4450_s0 = inlined_call_operand.vmem [shape: f32[16,8], index: 0, kind: input, shape index: {}]   ;;  %s4451_s1 = inlined_call_operand.vmem [shape: f32[3,64], index: 1, kind: input, shape index: {}]   ;;  %s4452_s2 = inlined_call_operand.vmem [shape: f32[1,64], index: 2, kind: input, shape index: {}]   ;;  %s4453_s3 = inlined_call_operand.hbm [shape: bf16[3,64,128], index: 3, kind: input, shape index: {}]   ;;  %s4454_s4 = inlined_call_operand.vmem [shape: f32[1,128], index: 4, kind: input, shape index: {}]   ;;  %s4455_s5 = inlined_call_operand.hbm [shape: bf16[16,128,128], index: 5, kind: input, shape index: {}]   ;;  %s4456_s6 = inlined_call_operand.vmem [shape: f32[1,128], index: 6, kind: input, shape index: {}]   ;;  %s4457_s7 = inlined_call_operand.hbm [shape: f32[8,128], index: 7, kind: output, shape index: {}]  }
   0x1   :  { %13 = vsyncpa [#allocation6], 0 }
   0x2   :  { %14 = vsyncpa [#allocation4], 0  ;;  %s3816_s24 = smov [#allocation2]  }
   0x3   :  { %s26_s25 = sshll.u32 %s3816_s24, 4  ;;  %s27_s25 = int_to_ptr.vmem [resolvable:$true] %s26_s25 }
   0x4   :  { %s3758_s26 = scalar_lea.vmem %s27_s25, 1536  ;;  %p3763_p1 = scmp.lt.s32.totalorder %s27_s25, %s27_s25 }
   0x5   :  { %p3759_p0 = scmp.ne.s32.totalorder %s27_s25, %s3758_s26  ;;  %p3764_p2 = scmp.lt.s32.totalorder %s3758_s26, %s3758_s26 }
   0x7   :  { %p3765_p3 = por %p3764_p2, %p3763_p1 }
   0x9   :  { %p3766_p4 = pnand %p3765_p3, %p3759_p0 }
   0xb   :  { %3769 = shalt.err (!%p3766_p4)
}
   0xc   :  { %s3817_s27 = smov 64   ;;  %s3818_s28 = smov 4  }
   0xd   :  { %32 = dma.hbm_to_vmem [thread:$0]  %s4453_s3, 1536, %s27_s25, [#allocation3], %s3817_s27, %s3817_s27, %s3818_s28  }
   0xe   :  { %s3819_s8 = smov [#allocation5]  }
   0xf   :  { %s40_s9 = sshll.u32 %s3819_s8, 4  ;;  %s41_s9 = int_to_ptr.vmem [resolvable:$true] %s40_s9 }
  0x10   :  { %s3778_s10 = scalar_lea.vmem %s41_s9, 16384  ;;  %p3783_p6 = scmp.lt.s32.totalorder %s41_s9, %s41_s9 }
  0x11   :  { %p3779_p5 = scmp.ne.s32.totalorder %s41_s9, %s3778_s10  ;;  %p3784_p7 = scmp.lt.s32.totalorder %s3778_s10, %s3778_s10 }
  0x13   :  { %p3785_p8 = por %p3784_p7, %p3783_p6 }
  0x15   :  { %p3786_p9 = pnand %p3785_p8, %p3779_p5 }
  0x17   :  { %3789 = shalt.err (!%p3786_p9)
}
  0x18   :  { %46 = dma.hbm_to_vmem [thread:$0]  %s4455_s5, 16384, %s41_s9, [#allocation6], %s3817_s27, %s3817_s27, %s3818_s28  }
  0x19   :  { %3810 = dma.done.wait [#allocation3], 1536  }
  0x1a   :  { %3811 = vsyncadd [#allocation3], 4294965760 }
  0x1b   :  { %3812 = dma.done.wait [#allocation6], 16384  }
  0x1c   :  { %3813 = vsyncadd [#allocation6], 4294950912  ;;  %v75_v0 = vlaneseq  ;;  %v3884_v5 = vld [vmem:[%s4450_s0 + $0x8] sm:$0xff]  ;;  %v3889_v6 = vld [vmem:[%s4450_s0] sm:$0xff]  ;;  %vm61_vm0 = vcmask 1040384   ;;  %vm68_vm1 = vcmask 1046528  }
  0x1d   :  { %v62_v9 = vrot.slane %v3889_v6, 7  ;;  %v63_v10 = vrot.slane %v3884_v5, 7  ;;  %v70_v18 = vrot.slane %v3884_v5, 1  ;;  %v3610_v24 = vld [vmem:[#allocation2 + $0x38] sm:$0xff]   ;;  %v3611_v27 = vld [vmem:[#allocation2 + $0x30] sm:$0xff]   ;;  %v3612_v32 = vld [vmem:[#allocation2 + $0x28] sm:$0xff]  }
  0x1e   :  { %v3870_v1 = vshrl.u32 %v75_v0, 7  ;;  %3594 = vmatprep.subr.bf16.mxu1 %v3610_v24  ;;  %3202 = vmatprep.subr.bf16.mxu0 %v3610_v24  ;;  %v69_v35 = vrot.slane %v3889_v6, 1  ;;  %v3613_v36 = vld [vmem:[#allocation2 + $0x20] sm:$0xff]   ;;  %v3990_v0 = vld [vmem:[#allocation2 + $0x18] sm:$0xff]   ;;  %vm646_vm2 = vcmask 523264   ;;  %vm3822_vm3 = vmmov 0  }
  0x1f   :  { %v3902_v13 = vsel %vm61_vm0, %v62_v9, %v63_v10  ;;  %v3910_v17 = vsel %vm61_vm0, 0.0, %v62_v9  ;;  %v3922_v23 = vsel %vm68_vm1, %v70_v18, 0.0  ;;  %3598 = vmatpush3.bf16.msra.mxu1 %v3610_v24  ;;  %3203 = vmatpush3.bf16.msra.mxu0 %v3610_v24  ;;  %v3997_v9 = vld [vmem:[#allocation2 + $0x58] sm:$0xff]   ;;  %s3823_s19 = smov [#allocation7]  }
  0x20   :  { %v3873_v2 = vsub.s32 2, %v3870_v1  ;;  %v3876_v3 = vsub.s32 0, %v3870_v1  ;;  %v3879_v4 = vsub.s32 1, %v3870_v1  ;;  %v3900_v12 = vsub.s32 3, %v3870_v1  ;;  %3595 = vmatprep.subr.bf16.mxu1 %v3611_v27  ;;  %3204 = vmatprep.subr.bf16.mxu0 %v3611_v27  ;;  %s2813_s20 = sshll.u32 %s3823_s19, 4  ;;  %s2814_s20 = int_to_ptr.vmem [resolvable:$true] %s2813_s20 }
  0x21   :  { %v3933_v30 = vsub.s32 5, %v3870_v1  ;;  %v3936_v31 = vsub.s32 4, %v3870_v1  ;;  %v3952_v41 = vsel %vm68_vm1, %v69_v35, %v70_v18  ;;  %v126_v44 = vsub.s32 7, %v3870_v1  ;;  %s3790_s21 = scalar_lea.vmem %s2814_s20, 128  ;;  %p3795_p11 = scmp.lt.s32.totalorder %s2814_s20, %s2814_s20 }
  0x22   :  { %v280_v7 = vrot.slane %v3884_v5, %v3873_v2  ;;  %v266_v8 = vrot.slane %v3884_v5, %v3876_v3  ;;  %v273_v11 = vrot.slane %v3884_v5, %v3879_v4  ;;  %v134_v14 = vrot.slane %v3902_v13, %v3876_v3  ;;  %p3791_p10 = scmp.ne.s32.totalorder %s2814_s20, %s3790_s21  ;;  %p3796_p12 = scmp.lt.s32.totalorder %s3790_s21, %s3790_s21 }
  0x23   :  { %v287_v15 = vrot.slane %v3884_v5, %v3900_v12  ;;  %v141_v16 = vrot.slane %v3902_v13, %v3879_v4  ;;  %v155_v19 = vrot.slane %v3902_v13, %v3900_v12  ;;  %v148_v20 = vrot.slane %v3902_v13, %v3873_v2  ;;  %3599 = vmatpush3.bf16.msra.mxu1 %v3611_v27 }
  0x24   :  { %282 = vbcast.lane.b32.xlu0 %v280_v7, 256  ;;  %268 = vbcast.lane.b32.xlu1 %v266_v8, 256  ;;  %v85_v21 = vrot.slane %v3910_v17, %v3879_v4  ;;  %v78_v22 = vrot.slane %v3910_v17, %v3876_v3  ;;  %v217_v25 = vrot.slane %v3889_v6, %v3879_v4  ;;  %v119_v45 = vsub.s32 6, %v3870_v1  ;;  %p3797_p13 = por %p3796_p12, %p3795_p11 }
  0x25   :  { %v210_v26 = vrot.slane %v3889_v6, %v3876_v3  ;;  %v421_v28 = vrot.slane %v3922_v23, %v3879_v4  ;;  %v414_v29 = vrot.slane %v3922_v23, %v3876_v3  ;;  %3205 = vmatpush3.bf16.msra.mxu0 %v3611_v27  ;;  %v99_v33 = vrot.slane %v3910_v17, %v3900_v12 }
  0x26   :  { %v92_v34 = vrot.slane %v3910_v17, %v3873_v2  ;;  %3596 = vmatprep.subr.bf16.mxu1 %v3612_v32  ;;  %3206 = vmatprep.subr.bf16.mxu0 %v3612_v32  ;;  %v231_v37 = vrot.slane %v3889_v6, %v3900_v12  ;;  %v224_v38 = vrot.slane %v3889_v6, %v3873_v2  ;;  %p3798_p0 = pnand %p3797_p13, %p3791_p10 }
  0x27   :  { %3600 = vmatpush3.bf16.msra.mxu1 %v3612_v32  ;;  %v435_v39 = vrot.slane %v3922_v23, %v3900_v12  ;;  %v428_v40 = vrot.slane %v3922_v23, %v3873_v2  ;;  %v365_v42 = vrot.slane %v3952_v41, %v3879_v4  ;;  %v358_v43 = vrot.slane %v3952_v41, %v3876_v3 }
  0x28   :  { %275 = vbcast.lane.b32.xlu1 %v273_v11, 256  ;;  %136 = vbcast.lane.b32.xlu0 %v134_v14, 256  ;;  %v379_v46 = vrot.slane %v3952_v41, %v3900_v12  ;;  %v372_v47 = vrot.slane %v3952_v41, %v3873_v2  ;;  %v169_v48 = vrot.slane %v3902_v13, %v3933_v30 }
  0x29   :  { %3207 = vmatpush3.bf16.msra.mxu0 %v3612_v32  ;;  %3597 = vmatprep.subr.bf16.mxu1 %v3613_v36  ;;  %v162_v49 = vrot.slane %v3902_v13, %v3936_v31  ;;  %v301_v50 = vrot.slane %v3884_v5, %v3933_v30  ;;  %v294_v51 = vrot.slane %v3884_v5, %v3936_v31 }
  0x2a   :  { %3208 = vmatprep.subr.bf16.mxu0 %v3613_v36  ;;  %v183_v52 = vrot.slane %v3902_v13, %v126_v44  ;;  %v176_v53 = vrot.slane %v3902_v13, %v119_v45  ;;  %v315_v54 = vrot.slane %v3884_v5, %v126_v44  ;;  %v308_v55 = vrot.slane %v3884_v5, %v119_v45 }
  0x2b   :  { %3601 = vmatpush3.bf16.msra.mxu1 %v3613_v36  ;;  %v113_v56 = vrot.slane %v3910_v17, %v3933_v30  ;;  %v106_v57 = vrot.slane %v3910_v17, %v3936_v31  ;;  %v245_v58 = vrot.slane %v3889_v6, %v3933_v30  ;;  %v238_v59 = vrot.slane %v3889_v6, %v3936_v31 }
  0x2c   :  { %289 = vbcast.lane.b32.xlu1 %v287_v15, 256  ;;  %143 = vbcast.lane.b32.xlu0 %v141_v16, 256  ;;  %v449_v60 = vrot.slane %v3922_v23, %v3933_v30  ;;  %v442_v61 = vrot.slane %v3922_v23, %v3936_v31  ;;  %v127_v62 = vrot.slane %v3910_v17, %v126_v44 }
  0x2d   :  { %3209 = vmatpush3.bf16.msra.mxu0 %v3613_v36  ;;  %v120_v63 = vrot.slane %v3910_v17, %v119_v45  ;;  %3226 = vmatprep.subr.bf16.mxu1 %v3990_v0  ;;  %v259_v1 = vrot.slane %v3889_v6, %v126_v44  ;;  %v252_v5 = vrot.slane %v3889_v6, %v119_v45 }
  0x2e   :  { %v463_v7 = vrot.slane %v3922_v23, %v126_v44  ;;  %v456_v8 = vrot.slane %v3922_v23, %v119_v45  ;;  %3250 = vmatprep.subr.bf16.mxu0 %v3997_v9  ;;  %v393_v10 = vrot.slane %v3952_v41, %v3933_v30  ;;  %v386_v11 = vrot.slane %v3952_v41, %v3936_v31 }
  0x2f   :  { %v407_v6 = vrot.slane %v3952_v41, %v126_v44  ;;  %v400_v12 = vrot.slane %v3952_v41, %v119_v45 }
  0x30   :  { %157 = vbcast.lane.b32.xlu1 %v155_v19, 256  ;;  %150 = vbcast.lane.b32.xlu0 %v148_v20, 256 }
  0x34   :  { %87 = vbcast.lane.b32.xlu1 %v85_v21, 256  ;;  %80 = vbcast.lane.b32.xlu0 %v78_v22, 256  ;;  %v58_v21 = vld [vmem:[%s4451_s1] sm:$0x7] }
  0x35   :  { %v4010_v24 = vrot.slane %v58_v21, %v3876_v3 }
  0x38   :  { %219 = vbcast.lane.b32.xlu1 %v217_v25, 256  ;;  %212 = vbcast.lane.b32.xlu0 %v210_v26, 256  ;;  %v4013_v25 = vrot.slane %v58_v21, %v3879_v4 }
  0x3c   :  { %423 = vbcast.lane.b32.xlu1 %v421_v28, 256  ;;  %416 = vbcast.lane.b32.xlu0 %v414_v29, 256  ;;  %v4016_v28 = vrot.slane %v58_v21, %v3873_v2  ;;  %v4027_v2 = vld [vmem:[%s4452_s2] ss:$0 sm:$0xff] }
  0x40   :  { %101 = vbcast.lane.b32.xlu1 %v99_v33, 256  ;;  %94 = vbcast.lane.b32.xlu0 %v92_v34, 256 }
  0x44   :  { %233 = vbcast.lane.b32.xlu1 %v231_v37, 256  ;;  %226 = vbcast.lane.b32.xlu0 %v224_v38, 256 }
  0x48   :  { %437 = vbcast.lane.b32.xlu1 %v435_v39, 256  ;;  %430 = vbcast.lane.b32.xlu0 %v428_v40, 256 }
  0x4c   :  { %367 = vbcast.lane.b32.xlu1 %v365_v42, 256  ;;  %360 = vbcast.lane.b32.xlu0 %v358_v43, 256 }
  0x50   :  { %381 = vbcast.lane.b32.xlu1 %v379_v46, 256  ;;  %374 = vbcast.lane.b32.xlu0 %v372_v47, 256 }
  0x54   :  { %171 = vbcast.lane.b32.xlu1 %v169_v48, 256  ;;  %164 = vbcast.lane.b32.xlu0 %v162_v49, 256 }
  0x58   :  { %303 = vbcast.lane.b32.xlu1 %v301_v50, 256  ;;  %296 = vbcast.lane.b32.xlu0 %v294_v51, 256 }
  0x5c   :  { %185 = vbcast.lane.b32.xlu1 %v183_v52, 256  ;;  %178 = vbcast.lane.b32.xlu0 %v176_v53, 256 }
  0x60   :  { %317 = vbcast.lane.b32.xlu1 %v315_v54, 256  ;;  %310 = vbcast.lane.b32.xlu0 %v308_v55, 256 }
  0x64   :  { %115 = vbcast.lane.b32.xlu1 %v113_v56, 256  ;;  %108 = vbcast.lane.b32.xlu0 %v106_v57, 256 }
  0x68   :  { %247 = vbcast.lane.b32.xlu1 %v245_v58, 256  ;;  %240 = vbcast.lane.b32.xlu0 %v238_v59, 256 }
  0x6c   :  { %451 = vbcast.lane.b32.xlu1 %v449_v60, 256  ;;  %444 = vbcast.lane.b32.xlu0 %v442_v61, 256 }
  0x70   :  { %129 = vbcast.lane.b32.xlu1 %v127_v62, 256  ;;  %122 = vbcast.lane.b32.xlu0 %v120_v63, 256 }
  0x74   :  { %261 = vbcast.lane.b32.xlu1 %v259_v1, 256  ;;  %254 = vbcast.lane.b32.xlu0 %v252_v5, 256 }
  0x78   :  { %465 = vbcast.lane.b32.xlu1 %v463_v7, 256  ;;  %458 = vbcast.lane.b32.xlu0 %v456_v8, 256 }
  0x7c   :  { %395 = vbcast.lane.b32.xlu1 %v393_v10, 256  ;;  %388 = vbcast.lane.b32.xlu0 %v386_v11, 256 }
  0x80   :  { %409 = vbcast.lane.b32.xlu1 %v407_v6, 256  ;;  %402 = vbcast.lane.b32.xlu0 %v400_v12, 256 }
  0x96   :  { %v283_v13 = vpop.permute.xlu0 %282  ;;  %v269_v14 = vpop.permute.xlu1 %268 }
  0x97   :  { %v331_v31 = vmul.f32 %v4013_v25, %v269_v14  ;;  %v333_v50 = vmul.f32 %v4013_v25, %v283_v13 }
  0x9a   :  { %v276_v15 = vpop.permute.xlu1 %275  ;;  %v137_v16 = vpop.permute.xlu0 %136 }
  0x9b   :  { %v199_v29 = vmul.f32 %v4010_v24, %v137_v16  ;;  %v332_v32 = vmul.f32 %v4013_v25, %v276_v15 }
  0x9d   :  { %v347_v3 = vadd.f32 %v331_v31, %v199_v29 }
  0x9e   :  { %v290_v17 = vpop.permute.xlu1 %289  ;;  %v144_v18 = vpop.permute.xlu0 %143 }
  0x9f   :  { %v200_v30 = vmul.f32 %v4010_v24, %v144_v18  ;;  %v334_v51 = vmul.f32 %v4013_v25, %v290_v17 }
  0xa1   :  { %v348_v35 = vadd.f32 %v332_v32, %v200_v30  ;;  %v3615_v32 = vld [vmem:[#allocation2 + $0x10] sm:$0xff]  }
  0xa2   :  { %v158_v19 = vpop.permute.xlu1 %157  ;;  %v151_v20 = vpop.permute.xlu0 %150 }
  0xa3   :  { %v202_v47 = vmul.f32 %v4010_v24, %v158_v19  ;;  %v201_v48 = vmul.f32 %v4010_v24, %v151_v20 }
  0xa5   :  { %v350_v56 = vadd.f32 %v334_v51, %v202_v47  ;;  %v349_v57 = vadd.f32 %v333_v50, %v201_v48  ;;  %v3619_v50 = vld [vmem:[#allocation2] sm:$0xff]  }
  0xa6   :  { %v88_v22 = vpop.permute.xlu1 %87  ;;  %v81_v23 = vpop.permute.xlu0 %80 }
  0xa7   :  { %v192_v60 = vmul.f32 %v4010_v24, %v88_v22  ;;  %v191_v61 = vmul.f32 %v4010_v24, %v81_v23 }
  0xaa   :  { %v220_v26 = vpop.permute.xlu1 %219  ;;  %v213_v27 = vpop.permute.xlu0 %212 }
  0xab   :  { %v324_v52 = vmul.f32 %v4013_v25, %v220_v26  ;;  %v323_v53 = vmul.f32 %v4013_v25, %v213_v27 }
  0xad   :  { %v340_v1 = vadd.f32 %v324_v52, %v192_v60  ;;  %v339_v5 = vadd.f32 %v323_v53, %v191_v61  ;;  %v3620_v53 = vld [vmem:[#allocation2 + $0x48] sm:$0xff]  }
  0xae   :  { %v424_v33 = vpop.permute.xlu1 %423  ;;  %v417_v34 = vpop.permute.xlu0 %416 }
  0xaf   :  { %v480_v4 = vmul.f32 %v4016_v28, %v424_v33  ;;  %v479_v36 = vmul.f32 %v4016_v28, %v417_v34 }
  0xb1   :  { %v496_v37 = vadd.f32 %v480_v4, %v348_v35  ;;  %v495_v38 = vadd.f32 %v479_v36, %v347_v3 }
  0xb2   :  { %v102_v39 = vpop.permute.xlu1 %101  ;;  %v95_v40 = vpop.permute.xlu0 %94 }
  0xb3   :  { %v4030_v41 = vadd.f32 %v4027_v2, %v495_v38  ;;  %v519_v42 = vadd.f32 %v4027_v2, %v496_v37  ;;  %v194_v15 = vmul.f32 %v4010_v24, %v102_v39  ;;  %v193_v16 = vmul.f32 %v4010_v24, %v95_v40 }
  0xb5   :  { %v534_v43 = vmax.f32 %v4030_v41, 0.0  ;;  %v535_v44 = vmax.f32 %v519_v42, 0.0  ;;  %v3617_v42 = vld [vmem:[#allocation2 + $0x8] sm:$0xff]  }
  0xb6   :  { %v234_v45 = vpop.permute.xlu1 %233  ;;  %v227_v46 = vpop.permute.xlu0 %226 }
  0xb7   :  { %v3011_v49 = vpack.c.bf16 %v535_v44, %v534_v43  ;;  %v326_v7 = vmul.f32 %v4013_v25, %v234_v45  ;;  %v325_v8 = vmul.f32 %v4013_v25, %v227_v46 }
  0xb9   :  { %3218 = vmatprep.mubr.msk.bf16.mxu1 %vm646_vm2, %v3011_v49  ;;  %v342_v21 = vadd.f32 %v326_v7, %v194_v15  ;;  %v341_v22 = vadd.f32 %v325_v8, %v193_v16  ;;  %v3618_v49 = vld [vmem:[#allocation2 + $0x50] sm:$0xff]  }
  0xba   :  { %v438_v54 = vpop.permute.xlu1 %437  ;;  %v431_v55 = vpop.permute.xlu0 %430 }
  0xbb   :  { %v482_v58 = vmul.f32 %v4016_v28, %v438_v54  ;;  %v481_v59 = vmul.f32 %v4016_v28, %v431_v55 }
  0xbd   :  { %v498_v62 = vadd.f32 %v482_v58, %v350_v56  ;;  %v497_v63 = vadd.f32 %v481_v59, %v349_v57  ;;  %v3621_v56 = vld [vmem:[#allocation2 + $0x40] sm:$0xff]  }
  0xbe   :  { %v368_v10 = vpop.permute.xlu1 %367  ;;  %v361_v11 = vpop.permute.xlu0 %360 }
  0xbf   :  { %v4050_v6 = vadd.f32 %v4027_v2, %v498_v62  ;;  %v520_v12 = vadd.f32 %v4027_v2, %v497_v63  ;;  %v472_v13 = vmul.f32 %v4016_v28, %v368_v10  ;;  %v471_v14 = vmul.f32 %v4016_v28, %v361_v11 }
  0xc1   :  { %v537_v17 = vmax.f32 %v4050_v6, 0.0  ;;  %v536_v18 = vmax.f32 %v520_v12, 0.0  ;;  %v488_v19 = vadd.f32 %v472_v13, %v340_v1  ;;  %v487_v20 = vadd.f32 %v471_v14, %v339_v5  ;;  %v3623_v6 = vld [vmem:[#allocation5 + $0x30] sm:$0xff]  }
  0xc2   :  { %v382_v23 = vpop.permute.xlu1 %381  ;;  %v375_v26 = vpop.permute.xlu0 %374 }
  0xc3   :  { %v3012_v27 = vpack.c.bf16 %v537_v17, %v536_v18  ;;  %v4060_v29 = vpack.c.bf16 %v536_v18, %v535_v44  ;;  %v474_v30 = vmul.f32 %v4016_v28, %v382_v23  ;;  %v473_v31 = vmul.f32 %v4016_v28, %v375_v26 }
  0xc4   :  { %v510_v33 = vadd.f32 %v4027_v2, %v487_v20  ;;  %v4066_v34 = vadd.f32 %v4027_v2, %v488_v19 }
  0xc5   :  { %v490_v3 = vadd.f32 %v474_v30, %v342_v21  ;;  %v489_v35 = vadd.f32 %v473_v31, %v341_v22  ;;  %3219 = vmatmul.mubr.msk.bf16.vlgmr.msra.gmra.mxu1 %vm646_vm2, %v3012_v27 }
  0xc6   :  { %v172_v4 = vpop.permute.xlu1 %171  ;;  %v165_v36 = vpop.permute.xlu0 %164  ;;  %v4069_v37 = vmax.f32 %v510_v33, 0.0  ;;  %v527_v38 = vmax.f32 %v4066_v34, 0.0  ;;  %3227 = vmatpush3.bf16.msra.mxu1 %v3990_v0 }
  0xc7   :  { %v4074_v39 = vadd.f32 %v4027_v2, %v490_v3  ;;  %v4077_v40 = vadd.f32 %v4027_v2, %v489_v35  ;;  %3228 = vmatprep.subr.bf16.mxu1 %v3615_v32  ;;  %v204_v62 = vmul.f32 %v4010_v24, %v172_v4  ;;  %v203_v63 = vmul.f32 %v4010_v24, %v165_v36 }
  0xc8   :  { %v3007_v44 = vpack.c.bf16 %v527_v38, %v4069_v37 }
  0xc9   :  { %v529_v45 = vmax.f32 %v4074_v39, 0.0  ;;  %v528_v46 = vmax.f32 %v4077_v40, 0.0  ;;  %v3821_v39 = vmov 0.0   ;;  %v3625_v40 = vld [vmem:[#allocation5 + $0x28] sm:$0xff]  }
  0xca   :  { %3210 = vmatprep.mubr.msk.bf16.mxu0 %vm646_vm2, %v3007_v44  ;;  %v304_v47 = vpop.permute.xlu1 %303  ;;  %v297_v0 = vpop.permute.xlu0 %296  ;;  %3229 = vmatpush3.bf16.msra.mxu1 %v3615_v32 }
  0xcb   :  { %v3008_v48 = vpack.c.bf16 %v529_v45, %v528_v46  ;;  %3230 = vmatprep.subr.bf16.mxu1 %v3617_v42  ;;  %v336_v61 = vmul.f32 %v4013_v25, %v304_v47 }
  0xcd   :  { %3211 = vmatmul.mubr.msk.bf16.vlgmr.msra.gmra.mxu0 %vm646_vm2, %v3008_v48  ;;  %v352_v7 = vadd.f32 %v336_v61, %v204_v62 }
  0xce   :  { %v186_v51 = vpop.permute.xlu1 %185  ;;  %v179_v52 = vpop.permute.xlu0 %178  ;;  %3251 = vmatpush3.bf16.msra.mxu0 %v3997_v9  ;;  %3231 = vmatpush3.bf16.msra.mxu1 %v3617_v42  ;;  %v335_v9 = vmul.f32 %v4013_v25, %v297_v0 }
  0xcf   :  { %3252 = vmatprep.subr.bf16.mxu0 %v3618_v49  ;;  %3232 = vmatprep.subr.bf16.mxu1 %v3619_v50  ;;  %v206_v30 = vmul.f32 %v4010_v24, %v186_v51  ;;  %v205_v31 = vmul.f32 %v4010_v24, %v179_v52 }
  0xd0   :  { %v351_v8 = vadd.f32 %v335_v9, %v203_v63 }
  0xd2   :  { %v318_v54 = vpop.permute.xlu1 %317  ;;  %v311_v55 = vpop.permute.xlu0 %310  ;;  %3253 = vmatpush3.bf16.msra.mxu0 %v3618_v49  ;;  %3233 = vmatpush3.bf16.msra.mxu1 %v3619_v50  ;;  %v542_v50 = vpack.c.bf16 %v4069_v37, %v4069_v37 }
  0xd3   :  { %3254 = vmatprep.subr.bf16.mxu0 %v3620_v53  ;;  %v338_v23 = vmul.f32 %v4013_v25, %v318_v54  ;;  %v337_v26 = vmul.f32 %v4013_v25, %v311_v55  ;;  %3274 = vmatprep.subr.bf16.mxu1 %v3821_v39 }
  0xd5   :  { %v354_v4 = vadd.f32 %v338_v23, %v206_v30  ;;  %v353_v36 = vadd.f32 %v337_v26, %v205_v31 }
  0xd6   :  { %v116_v57 = vpop.permute.xlu1 %115  ;;  %v109_v58 = vpop.permute.xlu0 %108  ;;  %3255 = vmatpush3.bf16.msra.mxu0 %v3620_v53 }
  0xd7   :  { %3256 = vmatprep.subr.bf16.mxu0 %v3621_v56  ;;  %v196_v47 = vmul.f32 %v4010_v24, %v116_v57  ;;  %v195_v0 = vmul.f32 %v4010_v24, %v109_v58 }
  0xda   :  { %v248_v59 = vpop.permute.xlu1 %247  ;;  %v241_v60 = vpop.permute.xlu0 %240  ;;  %3257 = vmatpush3.bf16.msra.mxu0 %v3621_v56 }
  0xdb   :  { %v328_v32 = vmul.f32 %v4013_v25, %v248_v59  ;;  %v327_v33 = vmul.f32 %v4013_v25, %v241_v60  ;;  %3294 = vmatprep.subr.bf16.mxu0 %v3821_v39 }
  0xdd   :  { %v344_v51 = vadd.f32 %v328_v32, %v196_v47  ;;  %v343_v52 = vadd.f32 %v327_v33, %v195_v0  ;;  %v3635_v47 = vld [vmem:[#allocation5] sm:$0xff]   ;;  %v3636_v0 = vld [vmem:[#allocation5 + $0x48] sm:$0xff]  }
  0xde   :  { %v452_v1 = vpop.permute.xlu1 %451  ;;  %v445_v5 = vpop.permute.xlu0 %444 }
  0xdf   :  { %v484_v10 = vmul.f32 %v4016_v28, %v452_v1  ;;  %v483_v11 = vmul.f32 %v4016_v28, %v445_v5 }
  0xe1   :  { %v500_v12 = vadd.f32 %v484_v10, %v352_v7  ;;  %v499_v13 = vadd.f32 %v483_v11, %v351_v8 }
  0xe2   :  { %v130_v14 = vpop.permute.xlu1 %129  ;;  %v123_v15 = vpop.permute.xlu0 %122 }
  0xe3   :  { %v4098_v16 = vadd.f32 %v4027_v2, %v500_v12  ;;  %v4101_v18 = vadd.f32 %v4027_v2, %v499_v13  ;;  %v198_v58 = vmul.f32 %v4010_v24, %v130_v14  ;;  %v197_v1 = vmul.f32 %v4010_v24, %v123_v15 }
  0xe4   :  { %v3820_v12 = vmov 0  }
  0xe5   :  { %v539_v19 = vmax.f32 %v4098_v16, 0.0  ;;  %v538_v20 = vmax.f32 %v4101_v18, 0.0  ;;  %v2844_v13 = vcombine.low %v3820_v12, %v542_v50  ;;  %v3628_v16 = vld [vmem:[#allocation5 + $0x68] sm:$0xff]   ;;  %v3629_v18 = vld [vmem:[#allocation5 + $0x18] sm:$0xff]  }
  0xe6   :  { %v262_v21 = vpop.permute.xlu1 %261  ;;  %v255_v22 = vpop.permute.xlu0 %254 }
  0xe7   :  { %v3013_v27 = vpack.c.bf16 %v539_v19, %v538_v20  ;;  %v330_v53 = vmul.f32 %v4013_v25, %v262_v21  ;;  %v329_v61 = vmul.f32 %v4013_v25, %v255_v22  ;;  %v3020_v34 = vpack.c.bf16 %v538_v20, %v537_v17  ;;  %v3631_v20 = vld [vmem:[#allocation5 + $0x10] sm:$0xff]  }
  0xe9   :  { %3222 = vmatprep.mubr.msk.bf16.mxu1 %vm646_vm2, %v3013_v27  ;;  %v346_v8 = vadd.f32 %v330_v53, %v198_v58  ;;  %v345_v21 = vadd.f32 %v329_v61, %v197_v1 }
  0xea   :  { %v466_v3 = vpop.permute.xlu1 %465  ;;  %v459_v35 = vpop.permute.xlu0 %458 }
  0xeb   :  { %v486_v42 = vmul.f32 %v4016_v28, %v466_v3  ;;  %v485_v44 = vmul.f32 %v4016_v28, %v459_v35 }
  0xed   :  { %v502_v48 = vadd.f32 %v486_v42, %v354_v4  ;;  %v501_v49 = vadd.f32 %v485_v44, %v353_v36  ;;  %v3632_v36 = vld [vmem:[#allocation5 + $0x58] sm:$0xff]   ;;  %v3633_v42 = vld [vmem:[#allocation5 + $0x8] sm:$0xff]   ;;  %v3634_v44 = vld [vmem:[#allocation5 + $0x50] sm:$0xff]  }
  0xee   :  { %v396_v54 = vpop.permute.xlu1 %395  ;;  %v389_v55 = vpop.permute.xlu0 %388 }
  0xef   :  { %v525_v56 = vadd.f32 %v4027_v2, %v502_v48  ;;  %v524_v59 = vadd.f32 %v4027_v2, %v501_v49  ;;  %v476_v60 = vmul.f32 %v4016_v28, %v396_v54  ;;  %v475_v57 = vmul.f32 %v4016_v28, %v389_v55  ;;  %v3637_v48 = vld [vmem:[#allocation5 + $0x40] sm:$0xff]  }
  0xf1   :  { %v4129_v9 = vmax.f32 %v525_v56, 0.0  ;;  %v540_v37 = vmax.f32 %v524_v59, 0.0  ;;  %v492_v62 = vadd.f32 %v476_v60, %v344_v51  ;;  %v491_v63 = vadd.f32 %v475_v57, %v343_v52 }
  0xf2   :  { %v410_v5 = vpop.permute.xlu1 %409  ;;  %v403_v7 = vpop.permute.xlu0 %402 }
  0xf3   :  { %v3014_v10 = vpack.c.bf16 %v4129_v9, %v540_v37  ;;  %v515_v11 = vadd.f32 %v4027_v2, %v492_v62  ;;  %v514_v14 = vadd.f32 %v4027_v2, %v491_v63  ;;  %v478_v25 = vmul.f32 %v4016_v28, %v410_v5 }
  0xf4   :  { %v477_v22 = vmul.f32 %v4016_v28, %v403_v7  ;;  %v3015_v28 = vpack.c.bf16 %v528_v46, %v527_v38  ;;  %v3021_v41 = vpack.c.bf16 %v540_v37, %v539_v19  ;;  %v3624_v38 = vld [vmem:[#allocation5 + $0x78] sm:$0xff]   ;;  %v557_v17 = vpack.c.bf16 %v4129_v9, %v4129_v9  ;;  %v3627_v46 = vld [vmem:[#allocation5 + $0x20] sm:$0xff]  }
  0xf5   :  { %v531_v23 = vmax.f32 %v515_v11, 0.0  ;;  %3223 = vmatmul.mubr.msk.bf16.gmra.mxu1 %vm646_vm2, %v3014_v10  ;;  %v530_v24 = vmax.f32 %v514_v14, 0.0  ;;  %v494_v15 = vadd.f32 %v478_v25, %v346_v8  ;;  %v3630_v19 = vld [vmem:[#allocation5 + $0x60] sm:$0xff]  }
  0xf6   :  { %v493_v26 = vadd.f32 %v477_v22, %v345_v21  ;;  %3234 = vmatprep.mubr.msk.bf16.mxu1 %vm646_vm2, %v2844_v13  ;;  %v4227_v25 = vld [vmem:[%s4454_s4] ss:$0 sm:$0xff] }
  0xf7   :  { %v3009_v27 = vpack.c.bf16 %v531_v23, %v530_v24  ;;  %v517_v30 = vadd.f32 %v4027_v2, %v494_v15  ;;  %v3016_v3 = vpack.c.bf16 %v530_v24, %v529_v45  ;;  %v3626_v45 = vld [vmem:[#allocation5 + $0x70] sm:$0xff]  }
  0xf8   :  { %v516_v31 = vadd.f32 %v4027_v2, %v493_v26 }
  0xf9   :  { %v533_v32 = vmax.f32 %v517_v30, 0.0  ;;  %3214 = vmatprep.mubr.msk.bf16.mxu0 %vm646_vm2, %v3009_v27 }
  0xfa   :  { %v532_v33 = vmax.f32 %v516_v31, 0.0 }
  0xfb   :  { %v3018_v4 = vpack.c.bf16 %v534_v43, %v533_v32  ;;  %v3622_v43 = vld [vmem:[#allocation5 + $0x38] sm:$0xff]  }
  0xfc   :  { %v3010_v35 = vpack.c.bf16 %v533_v32, %v532_v33  ;;  %v3017_v2 = vpack.c.bf16 %v532_v33, %v531_v23 }
  0xfd   :  { %3235 = vmatmul.mubr.msk.bf16.vlgmr.msra.gmra.mxu1 %vm646_vm2, %v3015_v28 }
  0xfe   :  { %3215 = vmatmul.mubr.msk.bf16.gmra.mxu0 %vm646_vm2, %v3010_v35  ;;  %3238 = vmatprep.mubr.msk.bf16.mxu1 %vm646_vm2, %v3016_v3 }
  0xff   :  { %3258 = vmatprep.mubr.msk.bf16.mxu0 %vm646_vm2, %v3015_v28  ;;  %3275 = vmatpush3.bf16.msra.mxu1 %v3622_v43  ;;  %v3638_v28 = vld [vmem:[#allocation5 + $0xb8] sm:$0xff]  }
 0x100   :  { %3276 = vmatprep.subr.bf16.mxu1 %v3821_v39 }
 0x103   :  { %3277 = vmatpush3.bf16.msra.mxu1 %v3623_v6 }
 0x104   :  { %3278 = vmatprep.subr.bf16.mxu1 %v3821_v39 }
 0x105   :  { %3239 = vmatmul.mubr.msk.bf16.gmra.mxu1 %vm646_vm2, %v3017_v2 }
 0x106   :  { %3259 = vmatmul.mubr.msk.bf16.vlgmr.msra.gmra.mxu0 %vm646_vm2, %v3016_v3  ;;  %3242 = vmatprep.mubr.msk.bf16.mxu1 %vm646_vm2, %v3018_v4 }
 0x107   :  { %3262 = vmatprep.mubr.msk.bf16.mxu0 %vm646_vm2, %v3017_v2  ;;  %3295 = vmatpush3.bf16.msra.mxu0 %v3624_v38 }
 0x108   :  { %3296 = vmatprep.subr.bf16.mxu0 %v3821_v39  ;;  %3279 = vmatpush3.bf16.msra.mxu1 %v3625_v40 }
 0x109   :  { %3280 = vmatprep.subr.bf16.mxu1 %v3821_v39 }
 0x10b   :  { %3297 = vmatpush3.bf16.msra.mxu0 %v3626_v45  ;;  %v3639_v45 = vld [vmem:[#allocation5 + $0xb0] sm:$0xff]  }
 0x10c   :  { %3298 = vmatprep.subr.bf16.mxu0 %v3821_v39  ;;  %3281 = vmatpush3.bf16.msra.mxu1 %v3627_v46  ;;  %v3640_v46 = vld [vmem:[#allocation5 + $0xf8] sm:$0xff]  }
 0x10d   :  { %3243 = vmatmul.mubr.msk.bf16.gmra.mxu1 %vm646_vm2, %v4060_v29  ;;  %3282 = vmatprep.subr.bf16.mxu1 %v3821_v39 }
 0x10e   :  { %3263 = vmatmul.mubr.msk.bf16.gmra.mxu0 %vm646_vm2, %v3018_v4  ;;  %3246 = vmatprep.mubr.msk.bf16.mxu1 %vm646_vm2, %v3020_v34 }
 0x10f   :  { %3266 = vmatprep.mubr.msk.bf16.mxu0 %vm646_vm2, %v4060_v29  ;;  %v2864_v29 = vcombine.low %v557_v17, %v3820_v12  ;;  %3299 = vmatpush3.bf16.msra.mxu0 %v3628_v16 }
 0x110   :  { %3300 = vmatprep.subr.bf16.mxu0 %v3821_v39  ;;  %3283 = vmatpush3.bf16.msra.mxu1 %v3629_v18 }
 0x111   :  { %3284 = vmatprep.subr.bf16.mxu1 %v3821_v39 }
 0x113   :  { %3301 = vmatpush3.bf16.msra.mxu0 %v3630_v19 }
 0x114   :  { %3302 = vmatprep.subr.bf16.mxu0 %v3821_v39  ;;  %3285 = vmatpush3.bf16.msra.mxu1 %v3631_v20 }
 0x115   :  { %3247 = vmatmul.mubr.msk.bf16.gmra.mxu1 %vm646_vm2, %v3021_v41  ;;  %3286 = vmatprep.subr.bf16.mxu1 %v3821_v39 }
 0x116   :  { %3267 = vmatmul.mubr.msk.bf16.gmra.mxu0 %vm646_vm2, %v3020_v34  ;;  %3290 = vmatprep.mubr.msk.bf16.mxu1 %vm3822_vm3, %v3821_v39 }
 0x117   :  { %3270 = vmatprep.mubr.msk.bf16.mxu0 %vm646_vm2, %v3021_v41  ;;  %3303 = vmatpush3.bf16.msra.mxu0 %v3632_v36 }
 0x118   :  { %3304 = vmatprep.subr.bf16.mxu0 %v3821_v39  ;;  %3287 = vmatpush3.bf16.msra.mxu1 %v3633_v42 }
 0x119   :  { %3288 = vmatprep.subr.bf16.mxu1 %v3821_v39 }
 0x11b   :  { %3305 = vmatpush3.bf16.msra.mxu0 %v3634_v44 }
 0x11c   :  { %3306 = vmatprep.subr.bf16.mxu0 %v3821_v39  ;;  %3289 = vmatpush3.bf16.msra.mxu1 %v3635_v47 }
 0x11d   :  { %3314 = vmatprep.subr.bf16.mxu1 %v3821_v39 }
 0x11e   :  { %3271 = vmatmul.mubr.msk.bf16.gmra.mxu0 %vm646_vm2, %v2864_v29 }
 0x11f   :  { %3307 = vmatpush3.bf16.msra.mxu0 %v3636_v0  ;;  %3310 = vmatprep.mubr.msk.bf16.mxu0 %vm3822_vm3, %v3821_v39 }
 0x120   :  { %3308 = vmatprep.subr.bf16.mxu0 %v3821_v39 }
 0x123   :  { %3309 = vmatpush3.bf16.msra.mxu0 %v3637_v48 }
 0x124   :  { %3334 = vmatprep.subr.bf16.mxu0 %v3821_v39 }
 0x185   :  { %v4198_v49 = vpop.f32.mrf.mxu1 }
 0x187   :  { %v4200_v50 = vpop.f32.mrf.mxu1 }
 0x189   :  { %v4202_v51 = vpop.f32.mrf.mxu1 }
 0x18b   :  { %v4206_v53 = vpop.f32.mrf.mxu1 }
 0x18d   :  { %v4204_v52 = vpop.f32.mrf.mxu0 }
 0x18f   :  { %v705_v54 = vpop.f32.mrf.mxu0 }
 0x191   :  { %v4212_v59 = vpop.f32.mrf.mxu0 }
 0x193   :  { %v708_v58 = vpop.f32.mrf.mxu0 }
 0x1b5   :  { %v4208_v55 = vpop.f32.mrf.mxu1 }
 0x1b7   :  { %v4210_v56 = vpop.f32.mrf.mxu1 }
 0x1b9   :  { %v4214_v60 = vpop.f32.mrf.mxu1 }
 0x1bb   :  { %v4216_v57 = vpop.f32.mrf.mxu1 }
 0x1bd   :  { %v4218_v61 = vpop.f32.mrf.mxu1 }
 0x1be   :  { %v3216_v9 = vpop.f32.mrf.mxu0 }
 0x1bf   :  { %v860_v37 = vpop.f32.mrf.mxu1 }
 0x1c0   :  { %v721_v62 = vpop.f32.mrf.mxu0  ;;  %v861_v11 = vadd.f32 %v860_v37, %v705_v54  ;;  %v3641_v54 = vld [vmem:[#allocation5 + $0xa8] sm:$0xff]  }
 0x1c1   :  { %v4220_v63 = vpop.f32.mrf.mxu1 }
 0x1c2   :  { %v3217_v1 = vpop.f32.mrf.mxu0 }
 0x1c3   :  { %v863_v5 = vpop.f32.mrf.mxu1 }
 0x1c4   :  { %v724_v7 = vpop.f32.mrf.mxu0  ;;  %v864_v23 = vadd.f32 %v863_v5, %v708_v58  ;;  %v3642_v58 = vld [vmem:[#allocation5 + $0xf0] sm:$0xff]   ;;  %v3643_v5 = vld [vmem:[#allocation5 + $0xa0] sm:$0xff]  }
 0x1c5   :  { %v3240_v8 = vpop.f32.mrf.mxu1 }
 0x1c6   :  { %v4222_v10 = vpop.f32.mrf.mxu0  ;;  %v885_v27 = vadd.f32 %v3240_v8, %v3216_v9 }
 0x1c7   :  { %v876_v12 = vpop.f32.mrf.mxu1 }
 0x1c8   :  { %v985_v13 = vpop.f32.mrf.mxu0  ;;  %v877_v3 = vadd.f32 %v876_v12, %v721_v62 }
 0x1c9   :  { %v1048_v21 = vadd.f32 %v985_v13, %v861_v11  ;;  %v3241_v14 = vpop.f32.mrf.mxu1 }
 0x1ca   :  { %v4229_v22 = vpop.f32.mrf.mxu0  ;;  %v888_v43 = vadd.f32 %v3241_v14, %v3217_v1 }
 0x1cb   :  { %v1071_v24 = vadd.f32 %v4227_v25, %v1048_v21  ;;  %v879_v15 = vpop.f32.mrf.mxu1 }
 0x1cc   :  { %v988_v26 = vpop.f32.mrf.mxu0  ;;  %v880_v16 = vadd.f32 %v879_v15, %v724_v7  ;;  %v3644_v7 = vld [vmem:[#allocation5 + $0xe8] sm:$0xff]  }
 0x1cd   :  { %v1087_v30 = vmax.f32 %v1071_v24, 0.0  ;;  %v1049_v31 = vadd.f32 %v988_v26, %v864_v23  ;;  %v4232_v32 = vpop.f32.mrf.mxu1  ;;  %v3645_v23 = vld [vmem:[#allocation5 + $0x98] sm:$0xff]   ;;  %v3646_v24 = vld [vmem:[#allocation5 + $0xe0] sm:$0xff]  }
 0x1ce   :  { %v3264_v33 = vpop.f32.mrf.mxu0 }
 0x1cf   :  { %v1103_v35 = vpack.c.bf16 %v1087_v30, %v1087_v30  ;;  %v1072_v2 = vadd.f32 %v4227_v25, %v1049_v31  ;;  %v1054_v4 = vadd.f32 %v3264_v33, %v885_v27  ;;  %v4235_v34 = vpop.f32.mrf.mxu1  ;;  %v869_v27 = vadd.f32 %v4218_v61, %v4204_v52 }
 0x1d0   :  { %v1001_v41 = vpop.f32.mrf.mxu0  ;;  %v872_v61 = vadd.f32 %v4220_v63, %v4212_v59  ;;  %v3651_v59 = vld [vmem:[#allocation5 + $0x80] sm:$0xff]   ;;  %v3652_v63 = vld [vmem:[#allocation5 + $0xc8] sm:$0xff]  }
 0x1d1   :  { %v1088_v38 = vmax.f32 %v1072_v2, 0.0  ;;  %v4238_v6 = vadd.f32 %v4227_v25, %v1054_v4  ;;  %v1052_v17 = vadd.f32 %v1001_v41, %v877_v3  ;;  %3291 = vmatmul.mubr.bf16.vlgmr.msra.gmra.mxu1 %v1103_v35  ;;  %v4240_v29 = vpop.f32.mrf.mxu1  ;;  %v3647_v35 = vld [vmem:[#allocation5 + $0x90] sm:$0xff]   ;;  %v3648_v2 = vld [vmem:[#allocation5 + $0xd8] sm:$0xff]  }
 0x1d2   :  { %3315 = vmatpush3.bf16.msra.mxu1 %v3638_v28  ;;  %v3265_v40 = vpop.f32.mrf.mxu0  ;;  %3330 = vmatprep.mubr.msk.bf16.mxu1 %vm3822_vm3, %v3821_v39 }
 0x1d3   :  { %v1104_v18 = vpack.c.bf16 %v1088_v38, %v1088_v38  ;;  %v4245_v19 = vadd.f32 %v4227_v25, %v1052_v17  ;;  %v1055_v20 = vadd.f32 %v3265_v40, %v888_v43  ;;  %v895_v36 = vpop.f32.mrf.mxu1  ;;  %3316 = vmatprep.subr.bf16.mxu1 %v3821_v39  ;;  %v3649_v38 = vld [vmem:[#allocation5 + $0x88] sm:$0xff]   ;;  %v1051_v40 = vadd.f32 %v4229_v22, %v872_v61  ;;  %v3653_v22 = vld [vmem:[#allocation5 + $0xc0] sm:$0xff]   ;;  %v3682_v61 = vld [vmem:[#allocation5 + $0x1d0] sm:$0xff]  }
 0x1d4   :  { %v1004_v42 = vpop.f32.mrf.mxu0  ;;  %v896_v8 = vadd.f32 %v895_v36, %v4206_v53 }
 0x1d5   :  { %v4249_v44 = vadd.f32 %v4227_v25, %v1055_v20  ;;  %v1053_v47 = vadd.f32 %v1004_v42, %v880_v16  ;;  %3311 = vmatmul.mubr.bf16.vlgmr.msra.gmra.mxu0 %v1104_v18  ;;  %v3248_v0 = vpop.f32.mrf.mxu1  ;;  %v1074_v16 = vadd.f32 %v4227_v25, %v1051_v40  ;;  %v3654_v18 = vld [vmem:[#allocation5 + $0x138] sm:$0xff]   ;;  %v3655_v42 = vld [vmem:[#allocation5 + $0x130] sm:$0xff]  }
 0x1d6   :  { %3317 = vmatpush3.bf16.msra.mxu1 %v3639_v45  ;;  %3335 = vmatpush3.bf16.msra.mxu0 %v3640_v46  ;;  %v4251_v48 = vpop.f32.mrf.mxu0  ;;  %v917_v13 = vadd.f32 %v3248_v0, %v4208_v55  ;;  %v3686_v40 = vld [vmem:[#allocation5 + $0x238] sm:$0xff]  }
 0x1d7   :  { %v4254_v9 = vadd.f32 %v4227_v25, %v1053_v47  ;;  %3318 = vmatprep.subr.bf16.mxu1 %v3821_v39  ;;  %3336 = vmatprep.subr.bf16.mxu0 %v3821_v39  ;;  %v908_v37 = vpop.f32.mrf.mxu1  ;;  %v1090_v36 = vmax.f32 %v1074_v16, 0.0  ;;  %v3656_v47 = vld [vmem:[#allocation5 + $0x178] sm:$0xff]  }
 0x1d8   :  { %v4258_v62 = vpop.f32.mrf.mxu0  ;;  %3350 = vmatprep.mubr.msk.bf16.mxu0 %vm3822_vm3, %v3821_v39  ;;  %v909_v15 = vadd.f32 %v908_v37, %v4210_v56  ;;  %v1050_v56 = vadd.f32 %v4222_v10, %v869_v27  ;;  %v3659_v37 = vld [vmem:[#allocation5 + $0x120] sm:$0xff]  }
 0x1d9   :  { %v3249_v11 = vpop.f32.mrf.mxu1  ;;  %v1106_v0 = vpack.c.bf16 %v1090_v36, %v1090_v36  ;;  %v3693_v36 = vld [vmem:[#allocation5 + $0x218] sm:$0xff]  }
 0x1da   :  { %3319 = vmatpush3.bf16.msra.mxu1 %v3641_v54  ;;  %3337 = vmatpush3.bf16.msra.mxu0 %v3642_v58  ;;  %v4262_v1 = vpop.f32.mrf.mxu0  ;;  %v920_v31 = vadd.f32 %v3249_v11, %v4214_v60  ;;  %v1073_v17 = vadd.f32 %v4227_v25, %v1050_v56  ;;  %v3657_v54 = vld [vmem:[#allocation5 + $0x128] sm:$0xff]   ;;  %v3658_v58 = vld [vmem:[#allocation5 + $0x170] sm:$0xff]   ;;  %v3675_v56 = vld [vmem:[#allocation5 + $0x1a0] sm:$0xff]  }
 0x1db   :  { %3320 = vmatprep.subr.bf16.mxu1 %v3821_v39  ;;  %3338 = vmatprep.subr.bf16.mxu0 %v3821_v39  ;;  %v911_v55 = vpop.f32.mrf.mxu1  ;;  %v3663_v11 = vld [vmem:[#allocation5 + $0x110] sm:$0xff]  }
 0x1dc   :  { %v1020_v12 = vpop.f32.mrf.mxu0  ;;  %v912_v4 = vadd.f32 %v911_v55, %v4216_v57  ;;  %v3650_v57 = vld [vmem:[#allocation5 + $0xd0] sm:$0xff]   ;;  %v1089_v46 = vmax.f32 %v1073_v17, 0.0  ;;  %v1092_v55 = vmax.f32 %v4254_v9, 0.0  ;;  %v3673_v9 = vld [vmem:[#allocation5 + $0x1a8] sm:$0xff]   ;;  %v3685_v17 = vld [vmem:[#allocation5 + $0x1c0] sm:$0xff]  }
 0x1dd   :  { %v1057_v21 = vadd.f32 %v1020_v12, %v896_v8  ;;  %v3662_v8 = vld [vmem:[#allocation5 + $0x160] sm:$0xff]   ;;  %v3664_v12 = vld [vmem:[#allocation5 + $0x158] sm:$0xff]  }
 0x1de   :  { %3321 = vmatpush3.bf16.msra.mxu1 %v3643_v5  ;;  %3339 = vmatpush3.bf16.msra.mxu0 %v3644_v7  ;;  %v3272_v14 = vpop.f32.mrf.mxu0  ;;  %v1105_v20 = vpack.c.bf16 %v1089_v46, %v1089_v46  ;;  %v3660_v5 = vld [vmem:[#allocation5 + $0x168] sm:$0xff]   ;;  %v3661_v7 = vld [vmem:[#allocation5 + $0x118] sm:$0xff]   ;;  %v3687_v46 = vld [vmem:[#allocation5 + $0x230] sm:$0xff]  }
 0x1df   :  { %v4270_v26 = vadd.f32 %v4227_v25, %v1057_v21  ;;  %v1062_v53 = vadd.f32 %v3272_v14, %v917_v13  ;;  %3322 = vmatprep.subr.bf16.mxu1 %v3821_v39  ;;  %3340 = vmatprep.subr.bf16.mxu0 %v3821_v39  ;;  %v3665_v13 = vld [vmem:[#allocation5 + $0x108] sm:$0xff]   ;;  %v3666_v21 = vld [vmem:[#allocation5 + $0x150] sm:$0xff]   ;;  %v3667_v14 = vld [vmem:[#allocation5 + $0x100] sm:$0xff]  }
 0x1e0   :  { %v1033_v30 = vpop.f32.mrf.mxu0 }
 0x1e1   :  { %v4278_v33 = vadd.f32 %v4227_v25, %v1062_v53  ;;  %v1060_v28 = vadd.f32 %v1033_v30, %v909_v15  ;;  %v3669_v15 = vld [vmem:[#allocation5 + $0x140] sm:$0xff]   ;;  %v3670_v53 = vld [vmem:[#allocation5 + $0x1b8] sm:$0xff]   ;;  %v3671_v30 = vld [vmem:[#allocation5 + $0x1b0] sm:$0xff]  }
 0x1e2   :  { %3323 = vmatpush3.bf16.msra.mxu1 %v3645_v23  ;;  %3341 = vmatpush3.bf16.msra.mxu0 %v3646_v24  ;;  %v3273_v3 = vpop.f32.mrf.mxu0  ;;  %v3668_v23 = vld [vmem:[#allocation5 + $0x148] sm:$0xff]   ;;  %v1091_v24 = vmax.f32 %v4245_v19, 0.0  ;;  %v3672_v19 = vld [vmem:[#allocation5 + $0x1f8] sm:$0xff]  }
 0x1e3   :  { %v4283_v41 = vadd.f32 %v4227_v25, %v1060_v28  ;;  %v1063_v52 = vadd.f32 %v3273_v3, %v920_v31  ;;  %3324 = vmatprep.subr.bf16.mxu1 %v3821_v39  ;;  %3342 = vmatprep.subr.bf16.mxu0 %v3821_v39  ;;  %v1108_v31 = vpack.c.bf16 %v1092_v55, %v1092_v55  ;;  %v3674_v28 = vld [vmem:[#allocation5 + $0x1f0] sm:$0xff]   ;;  %v3676_v3 = vld [vmem:[#allocation5 + $0x1e8] sm:$0xff]   ;;  %v3710_v55 = vld [vmem:[#allocation5 + $0x2e0] sm:$0xff]  }
 0x1e4   :  { %v1036_v60 = vpop.f32.mrf.mxu0  ;;  %v1107_v27 = vpack.c.bf16 %v1091_v24, %v1091_v24  ;;  %v3706_v24 = vld [vmem:[#allocation5 + $0x2f0] sm:$0xff]  }
 0x1e5   :  { %v4290_v10 = vadd.f32 %v4227_v25, %v1063_v52  ;;  %v1061_v43 = vadd.f32 %v1036_v60, %v912_v4  ;;  %v3679_v4 = vld [vmem:[#allocation5 + $0x190] sm:$0xff]   ;;  %v3680_v52 = vld [vmem:[#allocation5 + $0x1d8] sm:$0xff]   ;;  %v3681_v60 = vld [vmem:[#allocation5 + $0x188] sm:$0xff]  }
 0x1e6   :  { %3325 = vmatpush3.bf16.msra.mxu1 %v3647_v35  ;;  %3343 = vmatpush3.bf16.msra.mxu0 %v3648_v2  ;;  %v3677_v35 = vld [vmem:[#allocation5 + $0x198] sm:$0xff]   ;;  %v3678_v2 = vld [vmem:[#allocation5 + $0x1e0] sm:$0xff]  }
 0x1e7   :  { %v4295_v45 = vadd.f32 %v4227_v25, %v1061_v43  ;;  %3326 = vmatprep.subr.bf16.mxu1 %v3821_v39  ;;  %3344 = vmatprep.subr.bf16.mxu0 %v3821_v39  ;;  %v3683_v43 = vld [vmem:[#allocation5 + $0x180] sm:$0xff]  }
 0x1ea   :  { %3327 = vmatpush3.bf16.msra.mxu1 %v3649_v38  ;;  %3345 = vmatpush3.bf16.msra.mxu0 %v3650_v57  ;;  %v3684_v38 = vld [vmem:[#allocation5 + $0x1c8] sm:$0xff]   ;;  %v1093_v57 = vmax.f32 %v4238_v6, 0.0  ;;  %v3688_v6 = vld [vmem:[#allocation5 + $0x278] sm:$0xff]  }
 0x1eb   :  { %3328 = vmatprep.subr.bf16.mxu1 %v3821_v39  ;;  %3346 = vmatprep.subr.bf16.mxu0 %v3821_v39 }
 0x1ee   :  { %3329 = vmatpush3.bf16.msra.mxu1 %v3651_v59  ;;  %3347 = vmatpush3.bf16.msra.mxu0 %v3652_v63  ;;  %v1109_v59 = vpack.c.bf16 %v1093_v57, %v1093_v57  ;;  %v1094_v63 = vmax.f32 %v4249_v44, 0.0  ;;  %v3689_v44 = vld [vmem:[#allocation5 + $0x228] sm:$0xff]   ;;  %v3723_v57 = vld [vmem:[#allocation5 + $0x320] sm:$0xff]  }
 0x1ef   :  { %3348 = vmatprep.subr.bf16.mxu0 %v3821_v39  ;;  %3354 = vmatprep.subr.bf16.mxu1 %v3821_v39 }
 0x1f0   :  { %v1110_v16 = vpack.c.bf16 %v1094_v63, %v1094_v63  ;;  %v3727_v63 = vld [vmem:[#allocation5 + $0x310] sm:$0xff]  }
 0x1f1   :  { %3331 = vmatmul.mubr.bf16.vlgmr.msra.gmra.mxu1 %v1105_v20  ;;  %v3692_v20 = vld [vmem:[#allocation5 + $0x268] sm:$0xff]  }
 0x1f2   :  { %3349 = vmatpush3.bf16.msra.mxu0 %v3653_v22  ;;  %3355 = vmatpush3.bf16.msra.mxu1 %v3654_v18  ;;  %v3690_v22 = vld [vmem:[#allocation5 + $0x270] sm:$0xff]   ;;  %v3691_v18 = vld [vmem:[#allocation5 + $0x220] sm:$0xff]  }
 0x1f3   :  { %3356 = vmatprep.subr.bf16.mxu1 %v3821_v39  ;;  %3374 = vmatprep.subr.bf16.mxu0 %v3821_v39 }
 0x1f4   :  { %3370 = vmatprep.mubr.msk.bf16.mxu1 %vm3822_vm3, %v3821_v39 }
 0x1f5   :  { %3351 = vmatmul.mubr.bf16.vlgmr.msra.gmra.mxu0 %v1106_v0  ;;  %v3695_v0 = vld [vmem:[#allocation5 + $0x210] sm:$0xff]  }
 0x1f6   :  { %3357 = vmatpush3.bf16.msra.mxu1 %v3655_v42  ;;  %3375 = vmatpush3.bf16.msra.mxu0 %v3656_v47  ;;  %v3694_v42 = vld [vmem:[#allocation5 + $0x260] sm:$0xff]   ;;  %v893_v47 = vadd.f32 %v4235_v34, %v4200_v50  ;;  %v3700_v34 = vld [vmem:[#allocation5 + $0x248] sm:$0xff]  }
 0x1f7   :  { %3358 = vmatprep.subr.bf16.mxu1 %v3821_v39  ;;  %3376 = vmatprep.subr.bf16.mxu0 %v3821_v39  ;;  %v3699_v50 = vld [vmem:[#allocation5 + $0x200] sm:$0xff]  }
 0x1f8   :  { %3390 = vmatprep.mubr.msk.bf16.mxu0 %vm3822_vm3, %v3821_v39 }
 0x1fa   :  { %3359 = vmatpush3.bf16.msra.mxu1 %v3657_v54  ;;  %3377 = vmatpush3.bf16.msra.mxu0 %v3658_v58  ;;  %v3696_v54 = vld [vmem:[#allocation5 + $0x258] sm:$0xff]   ;;  %v1056_v58 = vadd.f32 %v4258_v62, %v893_v47  ;;  %v3701_v62 = vld [vmem:[#allocation5 + $0x240] sm:$0xff]   ;;  %v1100_v47 = vmax.f32 %v4295_v45, 0.0 }
 0x1fb   :  { %3360 = vmatprep.subr.bf16.mxu1 %v3821_v39  ;;  %3378 = vmatprep.subr.bf16.mxu0 %v3821_v39 }
 0x1fe   :  { %3361 = vmatpush3.bf16.msra.mxu1 %v3659_v37  ;;  %3379 = vmatpush3.bf16.msra.mxu0 %v3660_v5  ;;  %v3697_v37 = vld [vmem:[#allocation5 + $0x208] sm:$0xff]   ;;  %v3698_v5 = vld [vmem:[#allocation5 + $0x250] sm:$0xff]  }
 0x1ff   :  { %3362 = vmatprep.subr.bf16.mxu1 %v3821_v39  ;;  %3380 = vmatprep.subr.bf16.mxu0 %v3821_v39 }
 0x202   :  { %3363 = vmatpush3.bf16.msra.mxu1 %v3661_v7  ;;  %3381 = vmatpush3.bf16.msra.mxu0 %v3662_v8  ;;  %v1079_v7 = vadd.f32 %v4227_v25, %v1056_v58  ;;  %v1116_v58 = vpack.c.bf16 %v1100_v47, %v1100_v47 }
 0x203   :  { %3364 = vmatprep.subr.bf16.mxu1 %v3821_v39  ;;  %3382 = vmatprep.subr.bf16.mxu0 %v3821_v39 }
 0x204   :  { %v1095_v8 = vmax.f32 %v1079_v7, 0.0 }
 0x206   :  { %3365 = vmatpush3.bf16.msra.mxu1 %v3663_v11  ;;  %3383 = vmatpush3.bf16.msra.mxu0 %v3664_v12  ;;  %v3702_v11 = vld [vmem:[#allocation5 + $0x2b8] sm:$0xff]   ;;  %v1111_v12 = vpack.c.bf16 %v1095_v8, %v1095_v8 }
 0x207   :  { %3366 = vmatprep.subr.bf16.mxu1 %v3821_v39  ;;  %3384 = vmatprep.subr.bf16.mxu0 %v3821_v39 }
 0x20a   :  { %3367 = vmatpush3.bf16.msra.mxu1 %v3665_v13  ;;  %3385 = vmatpush3.bf16.msra.mxu0 %v3666_v21  ;;  %v1096_v13 = vmax.f32 %v4270_v26, 0.0  ;;  %v3703_v21 = vld [vmem:[#allocation5 + $0x2b0] sm:$0xff]   ;;  %v3705_v26 = vld [vmem:[#allocation5 + $0x2a8] sm:$0xff]  }
 0x20b   :  { %3368 = vmatprep.subr.bf16.mxu1 %v3821_v39  ;;  %3386 = vmatprep.subr.bf16.mxu0 %v3821_v39 }
 0x20e   :  { %3369 = vmatpush3.bf16.msra.mxu1 %v3667_v14  ;;  %3387 = vmatpush3.bf16.msra.mxu0 %v3668_v23  ;;  %v3704_v14 = vld [vmem:[#allocation5 + $0x2f8] sm:$0xff]   ;;  %v1112_v23 = vpack.c.bf16 %v1096_v13, %v1096_v13  ;;  %v3740_v13 = vld [vmem:[#allocation5 + $0x3e8] sm:$0xff]  }
 0x20f   :  { %3388 = vmatprep.subr.bf16.mxu0 %v3821_v39  ;;  %3394 = vmatprep.subr.bf16.mxu1 %v3821_v39 }
 0x211   :  { %3371 = vmatmul.mubr.bf16.vlgmr.msra.gmra.mxu1 %v1107_v27  ;;  %v3709_v27 = vld [vmem:[#allocation5 + $0x298] sm:$0xff]  }
 0x212   :  { %3389 = vmatpush3.bf16.msra.mxu0 %v3669_v15  ;;  %3395 = vmatpush3.bf16.msra.mxu1 %v3670_v53  ;;  %v3707_v15 = vld [vmem:[#allocation5 + $0x2a0] sm:$0xff]   ;;  %v3708_v53 = vld [vmem:[#allocation5 + $0x2e8] sm:$0xff]  }
 0x213   :  { %3396 = vmatprep.subr.bf16.mxu1 %v3821_v39  ;;  %3414 = vmatprep.subr.bf16.mxu0 %v3821_v39 }
 0x214   :  { %3410 = vmatprep.mubr.msk.bf16.mxu1 %vm3822_vm3, %v3821_v39 }
 0x215   :  { %3391 = vmatmul.mubr.bf16.vlgmr.msra.gmra.mxu0 %v1108_v31  ;;  %v3712_v31 = vld [vmem:[#allocation5 + $0x2d8] sm:$0xff]  }
 0x216   :  { %3397 = vmatpush3.bf16.msra.mxu1 %v3671_v30  ;;  %3415 = vmatpush3.bf16.msra.mxu0 %v3672_v19  ;;  %v901_v30 = vadd.f32 %v4232_v32, %v4198_v49  ;;  %v3711_v19 = vld [vmem:[#allocation5 + $0x290] sm:$0xff]   ;;  %v3715_v32 = vld [vmem:[#allocation5 + $0x280] sm:$0xff]  }
 0x217   :  { %3398 = vmatprep.subr.bf16.mxu1 %v3821_v39  ;;  %3416 = vmatprep.subr.bf16.mxu0 %v3821_v39 }
 0x218   :  { %3430 = vmatprep.mubr.msk.bf16.mxu0 %vm3822_vm3, %v3821_v39 }
 0x21a   :  { %3399 = vmatpush3.bf16.msra.mxu1 %v3673_v9  ;;  %3417 = vmatpush3.bf16.msra.mxu0 %v3674_v28  ;;  %v1058_v9 = vadd.f32 %v4251_v48, %v901_v30  ;;  %v904_v28 = vadd.f32 %v4240_v29, %v4202_v51  ;;  %v3716_v48 = vld [vmem:[#allocation5 + $0x2c8] sm:$0xff]   ;;  %v3717_v51 = vld [vmem:[#allocation5 + $0x2c0] sm:$0xff]   ;;  %v3718_v29 = vld [vmem:[#allocation5 + $0x338] sm:$0xff]   ;;  %v1101_v30 = vmax.f32 %v4278_v33, 0.0 }
 0x21b   :  { %3400 = vmatprep.subr.bf16.mxu1 %v3821_v39  ;;  %3418 = vmatprep.subr.bf16.mxu0 %v3821_v39 }
 0x21c   :  { %v1059_v49 = vadd.f32 %v4262_v1, %v904_v28 }
 0x21e   :  { %3401 = vmatpush3.bf16.msra.mxu1 %v3675_v56  ;;  %3419 = vmatpush3.bf16.msra.mxu0 %v3676_v3  ;;  %v3713_v56 = vld [vmem:[#allocation5 + $0x288] sm:$0xff]   ;;  %v3714_v3 = vld [vmem:[#allocation5 + $0x2d0] sm:$0xff]  }
 0x21f   :  { %3402 = vmatprep.subr.bf16.mxu1 %v3821_v39  ;;  %3420 = vmatprep.subr.bf16.mxu0 %v3821_v39 }
 0x222   :  { %3403 = vmatpush3.bf16.msra.mxu1 %v3677_v35  ;;  %3421 = vmatpush3.bf16.msra.mxu0 %v3678_v2  ;;  %v1081_v35 = vadd.f32 %v4227_v25, %v1058_v9  ;;  %v1102_v9 = vmax.f32 %v4290_v10, 0.0 }
 0x223   :  { %3404 = vmatprep.subr.bf16.mxu1 %v3821_v39  ;;  %3422 = vmatprep.subr.bf16.mxu0 %v3821_v39 }
 0x224   :  { %v1097_v2 = vmax.f32 %v1081_v35, 0.0 }
 0x226   :  { %3405 = vmatpush3.bf16.msra.mxu1 %v3679_v4  ;;  %3423 = vmatpush3.bf16.msra.mxu0 %v3680_v52  ;;  %v1082_v4 = vadd.f32 %v4227_v25, %v1059_v49  ;;  %v1113_v1 = vpack.c.bf16 %v1097_v2, %v1097_v2 }
 0x227   :  { %3406 = vmatprep.subr.bf16.mxu1 %v3821_v39  ;;  %3424 = vmatprep.subr.bf16.mxu0 %v3821_v39 }
 0x228   :  { %v1098_v52 = vmax.f32 %v1082_v4, 0.0 }
 0x22a   :  { %3407 = vmatpush3.bf16.msra.mxu1 %v3681_v60  ;;  %3425 = vmatpush3.bf16.msra.mxu0 %v3682_v61  ;;  %v3719_v60 = vld [vmem:[#allocation5 + $0x330] sm:$0xff]   ;;  %v3720_v61 = vld [vmem:[#allocation5 + $0x378] sm:$0xff]   ;;  %v1114_v25 = vpack.c.bf16 %v1098_v52, %v1098_v52 }
 0x22b   :  { %3408 = vmatprep.subr.bf16.mxu1 %v3821_v39  ;;  %3426 = vmatprep.subr.bf16.mxu0 %v3821_v39 }
 0x22e   :  { %3409 = vmatpush3.bf16.msra.mxu1 %v3683_v43  ;;  %3427 = vmatpush3.bf16.msra.mxu0 %v3684_v38  ;;  %v3721_v43 = vld [vmem:[#allocation5 + $0x328] sm:$0xff]   ;;  %v3722_v38 = vld [vmem:[#allocation5 + $0x370] sm:$0xff]  }
 0x22f   :  { %3428 = vmatprep.subr.bf16.mxu0 %v3821_v39  ;;  %3434 = vmatprep.subr.bf16.mxu1 %v3821_v39 }
 0x231   :  { %3411 = vmatmul.mubr.bf16.vlgmr.msra.gmra.mxu1 %v1109_v59  ;;  %v3726_v59 = vld [vmem:[#allocation5 + $0x360] sm:$0xff]  }
 0x232   :  { %3429 = vmatpush3.bf16.msra.mxu0 %v3685_v17  ;;  %3435 = vmatpush3.bf16.msra.mxu1 %v3686_v40  ;;  %v3724_v17 = vld [vmem:[#allocation5 + $0x368] sm:$0xff]   ;;  %v3725_v40 = vld [vmem:[#allocation5 + $0x318] sm:$0xff]  }
 0x233   :  { %3436 = vmatprep.subr.bf16.mxu1 %v3821_v39  ;;  %3454 = vmatprep.subr.bf16.mxu0 %v3821_v39 }
 0x234   :  { %3450 = vmatprep.mubr.msk.bf16.mxu1 %vm3822_vm3, %v3821_v39 }
 0x235   :  { %3431 = vmatmul.mubr.bf16.vlgmr.msra.gmra.mxu0 %v1110_v16  ;;  %v3730_v16 = vld [vmem:[#allocation5 + $0x350] sm:$0xff]  }
 0x236   :  { %3437 = vmatpush3.bf16.msra.mxu1 %v3687_v46  ;;  %3455 = vmatpush3.bf16.msra.mxu0 %v3688_v6  ;;  %v3728_v46 = vld [vmem:[#allocation5 + $0x358] sm:$0xff]   ;;  %v3729_v6 = vld [vmem:[#allocation5 + $0x308] sm:$0xff]  }
 0x237   :  { %3438 = vmatprep.subr.bf16.mxu1 %v3821_v39  ;;  %3456 = vmatprep.subr.bf16.mxu0 %v3821_v39 }
 0x238   :  { %3470 = vmatprep.mubr.msk.bf16.mxu0 %vm3822_vm3, %v3821_v39 }
 0x23a   :  { %3439 = vmatpush3.bf16.msra.mxu1 %v3689_v44  ;;  %3457 = vmatpush3.bf16.msra.mxu0 %v3690_v22  ;;  %v3731_v44 = vld [vmem:[#allocation5 + $0x300] sm:$0xff]   ;;  %v3732_v22 = vld [vmem:[#allocation5 + $0x348] sm:$0xff]  }
 0x23b   :  { %3440 = vmatprep.subr.bf16.mxu1 %v3821_v39  ;;  %3458 = vmatprep.subr.bf16.mxu0 %v3821_v39 }
 0x23e   :  { %3441 = vmatpush3.bf16.msra.mxu1 %v3691_v18  ;;  %3459 = vmatpush3.bf16.msra.mxu0 %v3692_v20  ;;  %v1099_v18 = vmax.f32 %v4283_v41, 0.0  ;;  %v3733_v20 = vld [vmem:[#allocation5 + $0x340] sm:$0xff]   ;;  %v3735_v41 = vld [vmem:[#allocation5 + $0x3b0] sm:$0xff]  }
 0x23f   :  { %3442 = vmatprep.subr.bf16.mxu1 %v3821_v39  ;;  %3460 = vmatprep.subr.bf16.mxu0 %v3821_v39 }
 0x242   :  { %3443 = vmatpush3.bf16.msra.mxu1 %v3693_v36  ;;  %3461 = vmatpush3.bf16.msra.mxu0 %v3694_v42  ;;  %v3734_v36 = vld [vmem:[#allocation5 + $0x3b8] sm:$0xff]   ;;  %v1115_v42 = vpack.c.bf16 %v1099_v18, %v1099_v18 }
 0x243   :  { %3444 = vmatprep.subr.bf16.mxu1 %v3821_v39  ;;  %3462 = vmatprep.subr.bf16.mxu0 %v3821_v39 }
 0x246   :  { %3445 = vmatpush3.bf16.msra.mxu1 %v3695_v0  ;;  %3463 = vmatpush3.bf16.msra.mxu0 %v3696_v54  ;;  %v3736_v54 = vld [vmem:[#allocation5 + $0x3f8] sm:$0xff]  }
 0x247   :  { %3446 = vmatprep.subr.bf16.mxu1 %v3821_v39  ;;  %3464 = vmatprep.subr.bf16.mxu0 %v3821_v39 }
 0x24a   :  { %3447 = vmatpush3.bf16.msra.mxu1 %v3697_v37  ;;  %3465 = vmatpush3.bf16.msra.mxu0 %v3698_v5 }
 0x24b   :  { %3448 = vmatprep.subr.bf16.mxu1 %v3821_v39  ;;  %3466 = vmatprep.subr.bf16.mxu0 %v3821_v39 }
 0x24e   :  { %3449 = vmatpush3.bf16.msra.mxu1 %v3699_v50  ;;  %3467 = vmatpush3.bf16.msra.mxu0 %v3700_v34  ;;  %v3737_v50 = vld [vmem:[#allocation5 + $0x3a8] sm:$0xff]   ;;  %v3738_v34 = vld [vmem:[#allocation5 + $0x3f0] sm:$0xff]  }
 0x24f   :  { %3468 = vmatprep.subr.bf16.mxu0 %v3821_v39  ;;  %3474 = vmatprep.subr.bf16.mxu1 %v3821_v39 }
 0x251   :  { %3451 = vmatmul.mubr.bf16.vlgmr.msra.gmra.mxu1 %v1111_v12  ;;  %v3739_v12 = vld [vmem:[#allocation5 + $0x3a0] sm:$0xff]  }
 0x252   :  { %3469 = vmatpush3.bf16.msra.mxu0 %v3701_v62  ;;  %3475 = vmatpush3.bf16.msra.mxu1 %v3702_v11 }
 0x253   :  { %3476 = vmatprep.subr.bf16.mxu1 %v3821_v39  ;;  %3494 = vmatprep.subr.bf16.mxu0 %v3821_v39 }
 0x254   :  { %3490 = vmatprep.mubr.msk.bf16.mxu1 %vm3822_vm3, %v3821_v39 }
 0x255   :  { %3471 = vmatmul.mubr.bf16.vlgmr.msra.gmra.mxu0 %v1112_v23  ;;  %v3742_v23 = vld [vmem:[#allocation5 + $0x3e0] sm:$0xff]  }
 0x256   :  { %3477 = vmatpush3.bf16.msra.mxu1 %v3703_v21  ;;  %3495 = vmatpush3.bf16.msra.mxu0 %v3704_v14  ;;  %v3741_v14 = vld [vmem:[#allocation5 + $0x398] sm:$0xff]  }
 0x257   :  { %3478 = vmatprep.subr.bf16.mxu1 %v3821_v39  ;;  %3496 = vmatprep.subr.bf16.mxu0 %v3821_v39 }
 0x258   :  { %3510 = vmatprep.mubr.msk.bf16.mxu0 %vm3822_vm3, %v3821_v39 }
 0x25a   :  { %3479 = vmatpush3.bf16.msra.mxu1 %v3705_v26  ;;  %3497 = vmatpush3.bf16.msra.mxu0 %v3706_v24  ;;  %v3743_v26 = vld [vmem:[#allocation5 + $0x390] sm:$0xff]   ;;  %v3744_v24 = vld [vmem:[#allocation5 + $0x3d8] sm:$0xff]  }
 0x25b   :  { %3480 = vmatprep.subr.bf16.mxu1 %v3821_v39  ;;  %3498 = vmatprep.subr.bf16.mxu0 %v3821_v39 }
 0x25e   :  { %3481 = vmatpush3.bf16.msra.mxu1 %v3707_v15  ;;  %3499 = vmatpush3.bf16.msra.mxu0 %v3708_v53  ;;  %v3745_v15 = vld [vmem:[#allocation5 + $0x388] sm:$0xff]   ;;  %v3746_v53 = vld [vmem:[#allocation5 + $0x3d0] sm:$0xff]  }
 0x25f   :  { %3482 = vmatprep.subr.bf16.mxu1 %v3821_v39  ;;  %3500 = vmatprep.subr.bf16.mxu0 %v3821_v39 }
 0x262   :  { %3483 = vmatpush3.bf16.msra.mxu1 %v3709_v27  ;;  %3501 = vmatpush3.bf16.msra.mxu0 %v3710_v55  ;;  %v3747_v27 = vld [vmem:[#allocation5 + $0x380] sm:$0xff]   ;;  %v3748_v55 = vld [vmem:[#allocation5 + $0x3c8] sm:$0xff]  }
 0x263   :  { %3484 = vmatprep.subr.bf16.mxu1 %v3821_v39  ;;  %3502 = vmatprep.subr.bf16.mxu0 %v3821_v39 }
 0x266   :  { %3485 = vmatpush3.bf16.msra.mxu1 %v3711_v19  ;;  %3503 = vmatpush3.bf16.msra.mxu0 %v3712_v31  ;;  %v3749_v19 = vld [vmem:[#allocation5 + $0x3c0] sm:$0xff]   ;;  %v1117_v31 = vpack.c.bf16 %v1101_v30, %v1101_v30 }
 0x267   :  { %3486 = vmatprep.subr.bf16.mxu1 %v3821_v39  ;;  %3504 = vmatprep.subr.bf16.mxu0 %v3821_v39 }
 0x26a   :  { %3487 = vmatpush3.bf16.msra.mxu1 %v3713_v56  ;;  %3505 = vmatpush3.bf16.msra.mxu0 %v3714_v3  ;;  %v1118_v3 = vpack.c.bf16 %v1102_v9, %v1102_v9 }
 0x26b   :  { %3488 = vmatprep.subr.bf16.mxu1 %v3821_v39  ;;  %3506 = vmatprep.subr.bf16.mxu0 %v3821_v39 }
 0x26e   :  { %3489 = vmatpush3.bf16.msra.mxu1 %v3715_v32  ;;  %3507 = vmatpush3.bf16.msra.mxu0 %v3716_v48 }
 0x26f   :  { %3508 = vmatprep.subr.bf16.mxu0 %v3821_v39  ;;  %3514 = vmatprep.subr.bf16.mxu1 %v3821_v39 }
 0x271   :  { %3491 = vmatmul.mubr.bf16.vlgmr.msra.gmra.mxu1 %v1113_v1 }
 0x272   :  { %3509 = vmatpush3.bf16.msra.mxu0 %v3717_v51  ;;  %3515 = vmatpush3.bf16.msra.mxu1 %v3718_v29 }
 0x273   :  { %3516 = vmatprep.subr.bf16.mxu1 %v3821_v39  ;;  %3534 = vmatprep.subr.bf16.mxu0 %v3821_v39 }
 0x274   :  { %3530 = vmatprep.mubr.msk.bf16.mxu1 %vm3822_vm3, %v3821_v39 }
 0x275   :  { %3511 = vmatmul.mubr.bf16.vlgmr.msra.gmra.mxu0 %v1114_v25 }
 0x276   :  { %3517 = vmatpush3.bf16.msra.mxu1 %v3719_v60  ;;  %3535 = vmatpush3.bf16.msra.mxu0 %v3720_v61 }
 0x277   :  { %3518 = vmatprep.subr.bf16.mxu1 %v3821_v39  ;;  %3536 = vmatprep.subr.bf16.mxu0 %v3821_v39 }
 0x278   :  { %3550 = vmatprep.mubr.msk.bf16.mxu0 %vm3822_vm3, %v3821_v39 }
 0x27a   :  { %3519 = vmatpush3.bf16.msra.mxu1 %v3721_v43  ;;  %3537 = vmatpush3.bf16.msra.mxu0 %v3722_v38 }
 0x27b   :  { %3520 = vmatprep.subr.bf16.mxu1 %v3821_v39  ;;  %3538 = vmatprep.subr.bf16.mxu0 %v3821_v39 }
 0x27e   :  { %3521 = vmatpush3.bf16.msra.mxu1 %v3723_v57  ;;  %3539 = vmatpush3.bf16.msra.mxu0 %v3724_v17 }
 0x27f   :  { %3522 = vmatprep.subr.bf16.mxu1 %v3821_v39  ;;  %3540 = vmatprep.subr.bf16.mxu0 %v3821_v39 }
 0x282   :  { %3523 = vmatpush3.bf16.msra.mxu1 %v3725_v40  ;;  %3541 = vmatpush3.bf16.msra.mxu0 %v3726_v59 }
 0x283   :  { %3524 = vmatprep.subr.bf16.mxu1 %v3821_v39  ;;  %3542 = vmatprep.subr.bf16.mxu0 %v3821_v39 }
 0x286   :  { %3525 = vmatpush3.bf16.msra.mxu1 %v3727_v63  ;;  %3543 = vmatpush3.bf16.msra.mxu0 %v3728_v46 }
 0x287   :  { %3526 = vmatprep.subr.bf16.mxu1 %v3821_v39  ;;  %3544 = vmatprep.subr.bf16.mxu0 %v3821_v39 }
 0x28a   :  { %3527 = vmatpush3.bf16.msra.mxu1 %v3729_v6  ;;  %3545 = vmatpush3.bf16.msra.mxu0 %v3730_v16 }
 0x28b   :  { %3528 = vmatprep.subr.bf16.mxu1 %v3821_v39  ;;  %3546 = vmatprep.subr.bf16.mxu0 %v3821_v39 }
 0x28e   :  { %3529 = vmatpush3.bf16.msra.mxu1 %v3731_v44  ;;  %3547 = vmatpush3.bf16.msra.mxu0 %v3732_v22 }
 0x28f   :  { %3548 = vmatprep.subr.bf16.mxu0 %v3821_v39  ;;  %3554 = vmatprep.subr.bf16.mxu1 %v3821_v39 }
 0x291   :  { %3531 = vmatmul.mubr.bf16.vlgmr.msra.gmra.mxu1 %v1115_v42  ;;  %v1457_v0 = vpop.f32.mrf.mxu1 }
 0x292   :  { %3549 = vmatpush3.bf16.msra.mxu0 %v3733_v20  ;;  %3555 = vmatpush3.bf16.msra.mxu1 %v3734_v36 }
 0x293   :  { %v3292_v37 = vpop.f32.mrf.mxu1  ;;  %3556 = vmatprep.subr.bf16.mxu1 %v3821_v39  ;;  %3574 = vmatprep.subr.bf16.mxu0 %v3821_v39 }
 0x294   :  { %3570 = vmatprep.mubr.msk.bf16.mxu1 %vm3822_vm3, %v3821_v39 }
 0x295   :  { %3551 = vmatmul.mubr.bf16.vlgmr.msra.gmra.mxu0 %v1116_v58  ;;  %v1460_v45 = vpop.f32.mrf.mxu1  ;;  %v1545_v5 = vpop.f32.mrf.mxu0 }
 0x296   :  { %v2783_v7 = vadd.f32 %v1545_v5, %v1457_v0  ;;  %3557 = vmatpush3.bf16.msra.mxu1 %v3735_v41  ;;  %3575 = vmatpush3.bf16.msra.mxu0 %v3736_v54 }
 0x297   :  { %v3293_v8 = vpop.f32.mrf.mxu1  ;;  %v3312_v62 = vpop.f32.mrf.mxu0  ;;  %3558 = vmatprep.subr.bf16.mxu1 %v3821_v39  ;;  %3576 = vmatprep.subr.bf16.mxu0 %v3821_v39 }
 0x298   :  { %3590 = vmatprep.mubr.msk.bf16.mxu0 %vm3822_vm3, %v3821_v39 }
 0x299   :  { %v1548_v11 = vpop.f32.mrf.mxu0 }
 0x29a   :  { %3559 = vmatpush3.bf16.msra.mxu1 %v3737_v50  ;;  %3577 = vmatpush3.bf16.msra.mxu0 %v3738_v34 }
 0x29b   :  { %v3313_v21 = vpop.f32.mrf.mxu0  ;;  %3560 = vmatprep.subr.bf16.mxu1 %v3821_v39  ;;  %3578 = vmatprep.subr.bf16.mxu0 %v3821_v39 }
 0x29e   :  { %3561 = vmatpush3.bf16.msra.mxu1 %v3739_v12  ;;  %3579 = vmatpush3.bf16.msra.mxu0 %v3740_v13 }
 0x29f   :  { %3562 = vmatprep.subr.bf16.mxu1 %v3821_v39  ;;  %3580 = vmatprep.subr.bf16.mxu0 %v3821_v39 }
 0x2a2   :  { %3563 = vmatpush3.bf16.msra.mxu1 %v3741_v14  ;;  %3581 = vmatpush3.bf16.msra.mxu0 %v3742_v23 }
 0x2a3   :  { %3564 = vmatprep.subr.bf16.mxu1 %v3821_v39  ;;  %3582 = vmatprep.subr.bf16.mxu0 %v3821_v39 }
 0x2a6   :  { %3565 = vmatpush3.bf16.msra.mxu1 %v3743_v26  ;;  %3583 = vmatpush3.bf16.msra.mxu0 %v3744_v24 }
 0x2a7   :  { %3566 = vmatprep.subr.bf16.mxu1 %v3821_v39  ;;  %3584 = vmatprep.subr.bf16.mxu0 %v3821_v39 }
 0x2aa   :  { %3567 = vmatpush3.bf16.msra.mxu1 %v3745_v15  ;;  %3585 = vmatpush3.bf16.msra.mxu0 %v3746_v53 }
 0x2ab   :  { %3568 = vmatprep.subr.bf16.mxu1 %v3821_v39  ;;  %3586 = vmatprep.subr.bf16.mxu0 %v3821_v39 }
 0x2ae   :  { %3569 = vmatpush3.bf16.msra.mxu1 %v3747_v27  ;;  %3587 = vmatpush3.bf16.msra.mxu0 %v3748_v55 }
 0x2af   :  { %3588 = vmatprep.subr.bf16.mxu0 %v3821_v39 }
 0x2b1   :  { %v1633_v28 = vpop.f32.mrf.mxu1  ;;  %3571 = vmatmul.mubr.bf16.vlgmr.msra.gmra.mxu1 %v1117_v31 }
 0x2b2   :  { %v2784_v56 = vadd.f32 %v2783_v7, %v1633_v28  ;;  %3589 = vmatpush3.bf16.msra.mxu0 %v3749_v19 }
 0x2b3   :  { %v3332_v35 = vpop.f32.mrf.mxu1 }
 0x2b5   :  { %v1636_v49 = vpop.f32.mrf.mxu1  ;;  %v1721_v33 = vpop.f32.mrf.mxu0  ;;  %3591 = vmatmul.mubr.bf16.vlgmr.msra.gmra.mxu0 %v1118_v3  ;;  %v3006_v3 = vld [vmem:[%s4456_s6] ss:$0 sm:$0xff] }
 0x2b6   :  { %v2785_v32 = vadd.f32 %v2784_v56, %v1721_v33 }
 0x2b7   :  { %v3333_v48 = vpop.f32.mrf.mxu1  ;;  %v3352_v2 = vpop.f32.mrf.mxu0 }
 0x2b9   :  { %v1724_v4 = vpop.f32.mrf.mxu0 }
 0x2bb   :  { %v3353_v51 = vpop.f32.mrf.mxu0 }
 0x2d1   :  { %v1809_v29 = vpop.f32.mrf.mxu1 }
 0x2d2   :  { %v2786_v1 = vadd.f32 %v2785_v32, %v1809_v29 }
 0x2d3   :  { %v3372_v52 = vpop.f32.mrf.mxu1 }
 0x2d5   :  { %v1812_v10 = vpop.f32.mrf.mxu1  ;;  %v1897_v60 = vpop.f32.mrf.mxu0 }
 0x2d6   :  { %v2787_v39 = vadd.f32 %v2786_v1, %v1897_v60 }
 0x2d7   :  { %v3373_v61 = vpop.f32.mrf.mxu1  ;;  %v3392_v25 = vpop.f32.mrf.mxu0 }
 0x2d9   :  { %v1900_v43 = vpop.f32.mrf.mxu0 }
 0x2db   :  { %v3393_v38 = vpop.f32.mrf.mxu0 }
 0x2f1   :  { %v1985_v57 = vpop.f32.mrf.mxu1 }
 0x2f2   :  { %v2788_v17 = vadd.f32 %v2787_v39, %v1985_v57 }
 0x2f3   :  { %v3412_v40 = vpop.f32.mrf.mxu1 }
 0x2f5   :  { %v1988_v59 = vpop.f32.mrf.mxu1  ;;  %v2073_v63 = vpop.f32.mrf.mxu0 }
 0x2f6   :  { %v2789_v46 = vadd.f32 %v2788_v17, %v2073_v63 }
 0x2f7   :  { %v3413_v6 = vpop.f32.mrf.mxu1  ;;  %v3432_v16 = vpop.f32.mrf.mxu0 }
 0x2f9   :  { %v2076_v44 = vpop.f32.mrf.mxu0 }
 0x2fb   :  { %v3433_v22 = vpop.f32.mrf.mxu0 }
 0x311   :  { %v2161_v18 = vpop.f32.mrf.mxu1 }
 0x312   :  { %v2790_v20 = vadd.f32 %v2789_v46, %v2161_v18 }
 0x313   :  { %v3452_v36 = vpop.f32.mrf.mxu1 }
 0x315   :  { %v2164_v42 = vpop.f32.mrf.mxu1  ;;  %v2249_v47 = vpop.f32.mrf.mxu0 }
 0x316   :  { %v2791_v0 = vadd.f32 %v2790_v20, %v2249_v47 }
 0x317   :  { %v3453_v41 = vpop.f32.mrf.mxu1  ;;  %v3472_v54 = vpop.f32.mrf.mxu0 }
 0x319   :  { %v2252_v58 = vpop.f32.mrf.mxu0 }
 0x31b   :  { %v3473_v37 = vpop.f32.mrf.mxu0 }
 0x331   :  { %v2337_v45 = vpop.f32.mrf.mxu1 }
 0x332   :  { %v2792_v53 = vadd.f32 %v2791_v0, %v2337_v45 }
 0x333   :  { %v3492_v5 = vpop.f32.mrf.mxu1 }
 0x335   :  { %v2340_v7 = vpop.f32.mrf.mxu1  ;;  %v2425_v50 = vpop.f32.mrf.mxu0 }
 0x336   :  { %v2793_v27 = vadd.f32 %v2792_v53, %v2425_v50 }
 0x337   :  { %v3493_v34 = vpop.f32.mrf.mxu1  ;;  %v3512_v8 = vpop.f32.mrf.mxu0 }
 0x339   :  { %v2428_v62 = vpop.f32.mrf.mxu0 }
 0x33b   :  { %v3513_v11 = vpop.f32.mrf.mxu0 }
 0x351   :  { %v2513_v12 = vpop.f32.mrf.mxu1 }
 0x352   :  { %v2794_v55 = vadd.f32 %v2793_v27, %v2513_v12 }
 0x353   :  { %v3532_v13 = vpop.f32.mrf.mxu1 }
 0x355   :  { %v2516_v21 = vpop.f32.mrf.mxu1  ;;  %v2601_v14 = vpop.f32.mrf.mxu0 }
 0x356   :  { %v2795_v19 = vadd.f32 %v2794_v55, %v2601_v14 }
 0x357   :  { %v3533_v23 = vpop.f32.mrf.mxu1  ;;  %v3552_v26 = vpop.f32.mrf.mxu0 }
 0x359   :  { %v2604_v24 = vpop.f32.mrf.mxu0 }
 0x35b   :  { %v3553_v15 = vpop.f32.mrf.mxu0 }
 0x371   :  { %v2689_v30 = vpop.f32.mrf.mxu1 }
 0x372   :  { %v2796_v9 = vadd.f32 %v2795_v19, %v2689_v30 }
 0x373   :  { %v3572_v31 = vpop.f32.mrf.mxu1 }
 0x375   :  { %v2692_v28 = vpop.f32.mrf.mxu1  ;;  %v2777_v56 = vpop.f32.mrf.mxu0 }
 0x376   :  { %v2797_v35 = vadd.f32 %v2796_v9, %v2777_v56 }
 0x377   :  { %v3573_v49 = vpop.f32.mrf.mxu1  ;;  %v3592_v33 = vpop.f32.mrf.mxu0 }
 0x378   :  { %v2805_v32 = vadd.f32 %v3006_v3, %v2797_v35 }
 0x379   :  { %v2780_v48 = vpop.f32.mrf.mxu0 }
 0x37a   :  { %2806 = vst [vmem:[#allocation7] sm:$0xff] %v2805_v32 }
 0x37b   :  { %v3593_v2 = vpop.f32.mrf.mxu0 }
 0x37c   :  { %3801 = shalt.err (!%p3798_p0)
}
 0x37d   :  { %2816 = dma.vmem_to_hbm [thread:$0]  %s2814_s20, 128, %s4457_s7, [#allocation4]  }
 0x37e   :  { %3814 = dma.done.wait [#allocation4], 128  }
 0x37f   :  { %3815 = vsyncadd [#allocation4], 4294967168 }
 0x380   :  { %2820 = vsyncpa [#allocation3], 1 }
 0x381   :  { %2821 = vsyncpa [#allocation6], 1 }
 0x382   :  { %2822 = vsyncpa [#allocation4], 1 }

</bundles_post_ra>
